<compile_context>
chip_gen: v7x
topology: tpu7x:2x2x1
jax: 0.10.0
libtpu: 0.0.40
codegen_flags: <defaults>
</compile_context>

<pallas_src>
import functools
from math import sqrt

import jax
import jax.numpy as jnp
from jax.experimental import pallas as pl
from jax.experimental.pallas import tpu as pltpu


# ------------------------------ kernel helpers ------------------------------

def _leaky(x, slope):
    return jnp.where(x >= 0, x, slope * x)


def _shift_lanes(x, s):
    """y[:, p] = x[:, p + s] with zero fill where p + s is out of range (static s)."""
    if s == 0:
        return x
    c = x.shape[0]
    z = jnp.zeros((c, abs(s)), x.dtype)
    if s > 0:
        return jnp.concatenate([x[:, s:], z], axis=-1)
    return jnp.concatenate([z, x[:, :s]], axis=-1)


# -------------------------------- kernels -----------------------------------

def _stage1_kernel(x_ref, w1_ref, wd_ref, bd_ref, r1_ref, st_ref, *, slope):
    """conv1(1x1)+LeakyReLU and per-channel BN statistics of the downsample conv."""
    x = x_ref[0]                                                     # (Cin, L) bf16
    # main branch: conv1 (1x1, no bias) + LeakyReLU, stored bf16 for the next MXU stage
    r1 = jnp.dot(w1_ref[...], x, preferred_element_type=jnp.float32)
    r1_ref[0] = _leaky(r1, slope).astype(jnp.bfloat16)
    # downsample conv (1x1 + bias): only its batch statistics are needed here;
    # the activation itself is cheaply recomputed in stage 2 (saves an HBM round trip).
    d = jnp.dot(wd_ref[...], x, preferred_element_type=jnp.float32) + bd_ref[...]
    st_ref[0] = jnp.concatenate(
        [jnp.sum(d, axis=-1, keepdims=True),
         jnp.sum(d * d, axis=-1, keepdims=True)], axis=-1)           # (C, 2)


def _stage2_kernel(x_ref, r1_ref, w2_ref, w3_ref, wd_ref, bd_ref,
                   scale_ref, shift_ref, o_ref, *, W, slope):
    """conv2(3x3)+lrelu -> conv3(1x1)+lrelu ; downsample conv + BN affine ; add."""
    r1 = r1_ref[0]                                                   # (C, L) bf16
    cout, L = r1.shape

    # source-column validity masks for the horizontal taps (flat-index shifts
    # wrap across row boundaries only in these two cases).
    col = jax.lax.broadcasted_iota(jnp.int32, (1, L), 1) % W
    ok_left = col != 0            # valid source column for dx = -1
    ok_right = col != (W - 1)     # valid source column for dx = +1

    # conv2: 3x3, pad=1 as a 9-tap shift-and-accumulate over the flat spatial axis.
    acc = jnp.zeros((cout, L), jnp.float32)
    for ky in range(3):
        for kx in range(3):
            t = _shift_lanes(r1, (ky - 1) * W + (kx - 1))
            if kx == 0:
                t = jnp.where(ok_left, t, jnp.zeros_like(t))
            elif kx == 2:
                t = jnp.where(ok_right, t, jnp.zeros_like(t))
            acc = acc + jnp.dot(w2_ref[ky * 3 + kx], t,
                                preferred_element_type=jnp.float32)
    r2 = _leaky(acc, slope)

    # conv3 (1x1) + LeakyReLU
    r3 = _leaky(jnp.dot(w3_ref[...], r2.astype(jnp.bfloat16),
                        preferred_element_type=jnp.float32), slope)

    # downsample branch: conv(1x1)+bias recomputed, fused BN affine, residual add.
    d = jnp.dot(wd_ref[...], x_ref[0], preferred_element_type=jnp.float32) + bd_ref[...]
    o_ref[0] = d * scale_ref[...] + shift_ref[...] + r3


# -------------------------------- wrapper ------------------------------------

def residual_block_forward(params, x_nchw, *, slope=0.2, eps=1e-5):
    N, Cin, H, W = x_nchw.shape
    C = params["w1"].shape[0]
    L = H * W

    x2 = x_nchw.reshape(N, Cin, L).astype(jnp.bfloat16)
    w1 = params["w1"].astype(jnp.bfloat16)                                    # (C, Cin)
    wd = params["wd"].astype(jnp.bfloat16)                                    # (C, Cin)
    bd = params["bd"].reshape(C, 1).astype(jnp.float32)
    w2 = jnp.transpose(params["w2"], (2, 3, 0, 1)).reshape(9, C, C).astype(jnp.bfloat16)
    w3 = params["w3"].astype(jnp.bfloat16)                                    # (C, C)

    cparams = pltpu.CompilerParams(dimension_semantics=("parallel",))

    r1, st = pl.pallas_call(
        functools.partial(_stage1_kernel, slope=slope),
        out_shape=(jax.ShapeDtypeStruct((N, C, L), jnp.bfloat16),
                   jax.ShapeDtypeStruct((N, C, 2), jnp.float32)),
        grid=(N,),
        in_specs=[pl.BlockSpec((1, Cin, L), lambda n: (n, 0, 0)),
                  pl.BlockSpec((C, Cin), lambda n: (0, 0)),
                  pl.BlockSpec((C, Cin), lambda n: (0, 0)),
                  pl.BlockSpec((C, 1), lambda n: (0, 0))],
        out_specs=(pl.BlockSpec((1, C, L), lambda n: (n, 0, 0)),
                   pl.BlockSpec((1, C, 2), lambda n: (n, 0, 0))),
        compiler_params=cparams,
    )(x2, w1, wd, bd)

    # (C,)-sized BatchNorm batch-statistics math (training mode) in plain JAX.
    st = jnp.sum(st, axis=0)                     # (C, 2): [sum, sum of squares]
    cnt = float(N * L)
    mean = st[:, 0] / cnt
    var = jnp.maximum(st[:, 1] / cnt - mean * mean, 0.0)   # clamp tiny negatives
    scale = params["gamma"] / jnp.sqrt(var + eps)
    shift = params["beta"] - mean * scale

    out = pl.pallas_call(
        functools.partial(_stage2_kernel, W=W, slope=slope),
        out_shape=jax.ShapeDtypeStruct((N, C, L), jnp.float32),
        grid=(N,),
        in_specs=[pl.BlockSpec((1, Cin, L), lambda n: (n, 0, 0)),
                  pl.BlockSpec((1, C, L), lambda n: (n, 0, 0)),
                  pl.BlockSpec((9, C, C), lambda n: (0, 0, 0)),
                  pl.BlockSpec((C, C), lambda n: (0, 0)),
                  pl.BlockSpec((C, Cin), lambda n: (0, 0)),
                  pl.BlockSpec((C, 1), lambda n: (0, 0)),
                  pl.BlockSpec((C, 1), lambda n: (0, 0)),
                  pl.BlockSpec((C, 1), lambda n: (0, 0))],
        out_specs=pl.BlockSpec((1, C, L), lambda n: (n, 0, 0)),
        compiler_params=cparams,
    )(x2, r1, w2, w3, wd, bd,
      scale.reshape(C, 1).astype(jnp.float32),
      shift.reshape(C, 1).astype(jnp.float32))

    return out.reshape(N, C, H, W)


# ------------------------------- parameters ----------------------------------

def init_params(key, indim):
    """Mirror of the PyTorch module's init (He-style conv init, BN ~ N(1, 0.02))."""
    C = int(indim * 0.9)
    k1, k2, k3, k4, k5 = jax.random.split(key, 5)

    def conv_w(k, cout, cin, ksz):
        std = sqrt(2.0 / (ksz * ksz * cout))
        return std * jax.random.normal(k, (cout, cin, ksz, ksz), jnp.float32)

    return dict(
        w1=conv_w(k1, C, indim, 1)[:, :, 0, 0],          # (C, Cin)
        w2=conv_w(k2, C, C, 3),                          # (C, C, 3, 3) OIHW
        w3=conv_w(k3, C, C, 1)[:, :, 0, 0],              # (C, C)
        wd=conv_w(k4, C, indim, 1)[:, :, 0, 0],          # (C, Cin), downsample conv
        bd=jnp.zeros((C,), jnp.float32),                 # downsample conv bias (zero init)
        gamma=1.0 + 0.02 * jax.random.normal(k5, (C,), jnp.float32),
        beta=jnp.zeros((C,), jnp.float32),
    )


# ----------------------------- plain-JAX reference ---------------------------

def reference_forward(params, x_nchw, *, slope=0.2, eps=1e-5):
    """Independent plain-JAX reference (same bf16 operand casts) for validation."""
    f32 = jnp.float32
    C = params["w1"].shape[0]
    xb = x_nchw.astype(jnp.bfloat16)

    def conv1x1(w, a):
        return jnp.einsum("oi,nihw->nohw", w.astype(jnp.bfloat16),
                          a.astype(jnp.bfloat16), preferred_element_type=f32)

    def lrelu(a):
        return jnp.where(a >= 0, a, slope * a)

    r = lrelu(conv1x1(params["w1"], xb))
    r = jax.lax.conv_general_dilated(
        r.astype(jnp.bfloat16), params["w2"].astype(jnp.bfloat16),
        window_strides=(1, 1), padding=((1, 1), (1, 1)),
        dimension_numbers=("NCHW", "OIHW", "NCHW"), preferred_element_type=f32)
    r = lrelu(r)
    r = lrelu(conv1x1(params["w3"], r))

    d = conv1x1(params["wd"], xb) + params["bd"].reshape(1, C, 1, 1)
    mean = jnp.mean(d, axis=(0, 2, 3)).reshape(1, C, 1, 1)
    var = jnp.var(d, axis=(0, 2, 3)).reshape(1, C, 1, 1)
    dn = (d - mean) / jnp.sqrt(var + eps)
    dn = dn * params["gamma"].reshape(1, C, 1, 1) + params["beta"].reshape(1, C, 1, 1)
    return dn + r


# ---------------------------------- main --------------------------------------

if __name__ == "__main__":
    indim = 40                                   # -> int(indim * 0.9) = 36 channels
    N, H, W = 2, 16, 16

    key = jax.random.PRNGKey(0)
    kp, kx = jax.random.split(key)
    params = init_params(kp, indim)
    x = jax.random.normal(kx, (N, indim, H, W), jnp.float32)

    fwd = jax.jit(residual_block_forward)
    out = jax.block_until_ready(fwd(params, x))

    assert out.shape == (N, int(indim * 0.9), H, W)
    assert bool(jnp.all(jnp.isfinite(out)))

    ref = reference_forward(params, x)
    err = float(jnp.max(jnp.abs(out - ref)))
    assert err < 5e-2, f"max abs error vs reference: {err}"

    print("KERNEL_OK")
</pallas_src>

<mosaic_0001>
module attributes {stable_mosaic.version = 11 : i64} {
  func.func @_stage1_kernel(%arg0: i32, %arg1: memref<1x40x256xbf16, #tpu.memory_space<vmem>>, %arg2: memref<36x40xbf16, #tpu.memory_space<vmem>>, %arg3: memref<36x40xbf16, #tpu.memory_space<vmem>>, %arg4: memref<36x1xf32, #tpu.memory_space<vmem>>, %arg5: memref<1x36x256xbf16, #tpu.memory_space<vmem>>, %arg6: memref<1x36x2xf32, #tpu.memory_space<vmem>>) attributes {dimension_semantics = [#tpu.dimension_semantics<parallel>], iteration_bounds = array<i64: 2>, scalar_prefetch = 0 : i64, scratch_operands = 0 : i64, tpu.core_type = #tpu.core_type<tc>, window_params = [{transform_indices = @transform_0, window_bounds = array<i64: 1, 40, 256>}, {pipeline_mode = #tpu.pipeline_mode<synchronous>, transform_indices = @transform_1, window_bounds = array<i64: 36, 40>}, {pipeline_mode = #tpu.pipeline_mode<synchronous>, transform_indices = @transform_2, window_bounds = array<i64: 36, 40>}, {pipeline_mode = #tpu.pipeline_mode<synchronous>, transform_indices = @transform_3, window_bounds = array<i64: 36, 1>}, {transform_indices = @transform_4, window_bounds = array<i64: 1, 36, 256>}, {transform_indices = @transform_5, window_bounds = array<i64: 1, 36, 2>}]} {
    %c0 = arith.constant 0 : index
    %c0_0 = arith.constant 0 : index
    %c0_1 = arith.constant 0 : index
    %0 = vector.load %arg1[%c0, %c0_0, %c0_1] : memref<1x40x256xbf16, #tpu.memory_space<vmem>>, vector<1x40x256xbf16>
    %1 = vector.shape_cast %0 : vector<1x40x256xbf16> to vector<40x256xbf16>
    %c0_2 = arith.constant 0 : index
    %c0_3 = arith.constant 0 : index
    %2 = vector.load %arg2[%c0_2, %c0_3] : memref<36x40xbf16, #tpu.memory_space<vmem>>, vector<36x40xbf16>
    %cst = arith.constant dense<0.000000e+00> : vector<36x256xf32>
    %3 = tpu.matmul %2, %1, %cst {dimension_numbers = #tpu.dot_dimension_numbers<[1], [0], [0], [1], [0, 0, 1, 1], [], []>} : vector<36x40xbf16>, vector<40x256xbf16>, vector<36x256xf32> -> vector<36x256xf32>
    %cst_4 = arith.constant 0.000000e+00 : f32
    %4 = vector.broadcast %cst_4 : f32 to vector<36x256xf32>
    %5 = arith.cmpf oge, %3, %4 : vector<36x256xf32>
    %cst_5 = arith.constant 2.000000e-01 : f32
    %6 = vector.broadcast %cst_5 : f32 to vector<36x256xf32>
    %7 = arith.mulf %6, %3 : vector<36x256xf32>
    %8 = arith.select %5, %3, %7 : vector<36x256xi1>, vector<36x256xf32>
    %9 = arith.truncf %8 : vector<36x256xf32> to vector<36x256xbf16>
    %c0_6 = arith.constant 0 : index
    %c0_7 = arith.constant 0 : index
    %c0_8 = arith.constant 0 : index
    %10 = vector.load %arg5[%c0_6, %c0_7, %c0_8] : memref<1x36x256xbf16, #tpu.memory_space<vmem>>, vector<1x36x256xbf16>
    %11 = vector.shape_cast %10 : vector<1x36x256xbf16> to vector<36x256xbf16>
    %12 = vector.shape_cast %9 : vector<36x256xbf16> to vector<1x36x256xbf16>
    tpu.vector_store %arg5[%c0_6, %c0_7, %c0_8], %12 {strides = array<i32>} : memref<1x36x256xbf16, #tpu.memory_space<vmem>>, vector<1x36x256xbf16>,
    %c0_9 = arith.constant 0 : index
    %c0_10 = arith.constant 0 : index
    %13 = vector.load %arg3[%c0_9, %c0_10] : memref<36x40xbf16, #tpu.memory_space<vmem>>, vector<36x40xbf16>
    %cst_11 = arith.constant dense<0.000000e+00> : vector<36x256xf32>
    %14 = tpu.matmul %13, %1, %cst_11 {dimension_numbers = #tpu.dot_dimension_numbers<[1], [0], [0], [1], [0, 0, 1, 1], [], []>} : vector<36x40xbf16>, vector<40x256xbf16>, vector<36x256xf32> -> vector<36x256xf32>
    %c0_12 = arith.constant 0 : index
    %c0_13 = arith.constant 0 : index
    %15 = vector.load %arg4[%c0_12, %c0_13] : memref<36x1xf32, #tpu.memory_space<vmem>>, vector<36x1xf32>
    %16 = vector.broadcast %15 : vector<36x1xf32> to vector<36x256xf32>
    %17 = arith.addf %14, %16 : vector<36x256xf32>
    %cst_14 = arith.constant dense<0.000000e+00> : vector<36xf32>
    %18 = vector.multi_reduction <add>, %17, %cst_14 [1] : vector<36x256xf32> to vector<36xf32>
    %19 = vector.shape_cast %18 : vector<36xf32> to vector<36x1xf32>
    %20 = arith.mulf %17, %17 : vector<36x256xf32>
    %cst_15 = arith.constant dense<0.000000e+00> : vector<36xf32>
    %21 = vector.multi_reduction <add>, %20, %cst_15 [1] : vector<36x256xf32> to vector<36xf32>
    %22 = vector.shape_cast %21 : vector<36xf32> to vector<36x1xf32>
    %23 = tpu.concatenate %19, %22 in 1 : vector<36x1xf32>, vector<36x1xf32> -> vector<36x2xf32>
    %c0_16 = arith.constant 0 : index
    %c0_17 = arith.constant 0 : index
    %c0_18 = arith.constant 0 : index
    %24 = vector.load %arg6[%c0_16, %c0_17, %c0_18] : memref<1x36x2xf32, #tpu.memory_space<vmem>>, vector<1x36x2xf32>
    %25 = vector.shape_cast %24 : vector<1x36x2xf32> to vector<36x2xf32>
    %26 = vector.shape_cast %23 : vector<36x2xf32> to vector<1x36x2xf32>
    tpu.vector_store %arg6[%c0_16, %c0_17, %c0_18], %26 {strides = array<i32>} : memref<1x36x2xf32, #tpu.memory_space<vmem>>, vector<1x36x2xf32>,
    return
  }
  func.func @transform_0(%arg0: i32) -> (i32, i32, i32) {
    %c0_i32 = arith.constant 0 : i32
    %c0_i32_0 = arith.constant 0 : i32
    %c0_i32_1 = arith.constant 0 : i32
    return %arg0, %c0_i32, %c0_i32_0 : i32, i32, i32
  }
  func.func @transform_1(%arg0: i32) -> (i32, i32) {
    %c0_i32 = arith.constant 0 : i32
    %c0_i32_0 = arith.constant 0 : i32
    %c0_i32_1 = arith.constant 0 : i32
    return %c0_i32, %c0_i32_0 : i32, i32
  }
  func.func @transform_2(%arg0: i32) -> (i32, i32) {
    %c0_i32 = arith.constant 0 : i32
    %c0_i32_0 = arith.constant 0 : i32
    %c0_i32_1 = arith.constant 0 : i32
    return %c0_i32, %c0_i32_0 : i32, i32
  }
  func.func @transform_3(%arg0: i32) -> (i32, i32) {
    %c0_i32 = arith.constant 0 : i32
    %c0_i32_0 = arith.constant 0 : i32
    %c0_i32_1 = arith.constant 0 : i32
    return %c0_i32, %c0_i32_0 : i32, i32
  }
  func.func @transform_4(%arg0: i32) -> (i32, i32, i32) {
    %c0_i32 = arith.constant 0 : i32
    %c0_i32_0 = arith.constant 0 : i32
    %c0_i32_1 = arith.constant 0 : i32
    return %arg0, %c0_i32, %c0_i32_0 : i32, i32, i32
  }
  func.func @transform_5(%arg0: i32) -> (i32, i32, i32) {
    %c0_i32 = arith.constant 0 : i32
    %c0_i32_0 = arith.constant 0 : i32
    %c0_i32_1 = arith.constant 0 : i32
    return %arg0, %c0_i32, %c0_i32_0 : i32, i32, i32
  }
}

module attributes {stable_mosaic.version = 11 : i64} {
  func.func @_stage2_kernel(%arg0: i32, %arg1: memref<1x40x256xbf16, #tpu.memory_space<vmem>>, %arg2: memref<1x36x256xbf16, #tpu.memory_space<vmem>>, %arg3: memref<9x36x36xbf16, #tpu.memory_space<vmem>>, %arg4: memref<36x36xbf16, #tpu.memory_space<vmem>>, %arg5: memref<36x40xbf16, #tpu.memory_space<vmem>>, %arg6: memref<36x1xf32, #tpu.memory_space<vmem>>, %arg7: memref<36x1xf32, #tpu.memory_space<vmem>>, %arg8: memref<36x1xf32, #tpu.memory_space<vmem>>, %arg9: memref<1x36x256xf32, #tpu.memory_space<vmem>>) attributes {dimension_semantics = [#tpu.dimension_semantics<parallel>], iteration_bounds = array<i64: 2>, scalar_prefetch = 0 : i64, scratch_operands = 0 : i64, tpu.core_type = #tpu.core_type<tc>, window_params = [{transform_indices = @transform_0, window_bounds = array<i64: 1, 40, 256>}, {transform_indices = @transform_1, window_bounds = array<i64: 1, 36, 256>}, {pipeline_mode = #tpu.pipeline_mode<synchronous>, transform_indices = @transform_2, window_bounds = array<i64: 9, 36, 36>}, {pipeline_mode = #tpu.pipeline_mode<synchronous>, transform_indices = @transform_3, window_bounds = array<i64: 36, 36>}, {pipeline_mode = #tpu.pipeline_mode<synchronous>, transform_indices = @transform_4, window_bounds = array<i64: 36, 40>}, {pipeline_mode = #tpu.pipeline_mode<synchronous>, transform_indices = @transform_5, window_bounds = array<i64: 36, 1>}, {pipeline_mode = #tpu.pipeline_mode<synchronous>, transform_indices = @transform_6, window_bounds = array<i64: 36, 1>}, {pipeline_mode = #tpu.pipeline_mode<synchronous>, transform_indices = @transform_7, window_bounds = array<i64: 36, 1>}, {transform_indices = @transform_8, window_bounds = array<i64: 1, 36, 256>}]} {
    %c0 = arith.constant 0 : index
    %c0_0 = arith.constant 0 : index
    %c0_1 = arith.constant 0 : index
    %0 = vector.load %arg2[%c0, %c0_0, %c0_1] : memref<1x36x256xbf16, #tpu.memory_space<vmem>>, vector<1x36x256xbf16>
    %1 = vector.shape_cast %0 : vector<1x36x256xbf16> to vector<36x256xbf16>
    %2 = tpu.iota {dimensions = array<i32: 1>} : vector<1x256xi32>
    %c16_i32 = arith.constant 16 : i32
    %c0_i32 = arith.constant 0 : i32
    %3 = arith.cmpi eq, %c16_i32, %c0_i32 : i32
    %c1_i32 = arith.constant 1 : i32
    %4 = arith.select %3, %c1_i32, %c16_i32 : i32
    %5 = vector.broadcast %4 : i32 to vector<1x256xi32>
    %6 = arith.remsi %2, %5 : vector<1x256xi32>
    %c0_i32_2 = arith.constant 0 : i32
    %7 = vector.broadcast %c0_i32_2 : i32 to vector<1x256xi32>
    %8 = arith.cmpi ne, %6, %7 : vector<1x256xi32>
    %c0_i32_3 = arith.constant 0 : i32
    %9 = vector.broadcast %c0_i32_3 : i32 to vector<1x256xi32>
    %10 = arith.cmpi slt, %6, %9 : vector<1x256xi32>
    %c0_i32_4 = arith.constant 0 : i32
    %11 = arith.cmpi slt, %4, %c0_i32_4 : i32
    %12 = vector.broadcast %11 : i1 to vector<1x256xi1>
    %13 = vector.broadcast %12 : vector<1x256xi1> to vector<1x256xi1>
    %14 = arith.xori %10, %13 : vector<1x256xi1>
    %15 = arith.andi %14, %8 : vector<1x256xi1>
    %16 = vector.broadcast %4 : i32 to vector<1x256xi32>
    %17 = arith.addi %6, %16 : vector<1x256xi32>
    %18 = arith.select %15, %17, %6 : vector<1x256xi1>, vector<1x256xi32>
    %c0_i32_5 = arith.constant 0 : i32
    %19 = vector.broadcast %c0_i32_5 : i32 to vector<1x256xi32>
    %20 = arith.cmpi ne, %18, %19 : vector<1x256xi32>
    %c15_i32 = arith.constant 15 : i32
    %21 = vector.broadcast %c15_i32 : i32 to vector<1x256xi32>
    %22 = arith.cmpi ne, %18, %21 : vector<1x256xi32>
    %cst = arith.constant 0.000000e+00 : f32
    %23 = vector.broadcast %cst : f32 to vector<36x256xf32>
    %cst_6 = arith.constant 0.000000e+00 : bf16
    %24 = vector.broadcast %cst_6 : bf16 to vector<36x17xbf16>
    %25 = vector.extract_strided_slice %1 {offsets = [0, 0], sizes = [36, 239], strides = [1, 1]} : vector<36x256xbf16> to vector<36x239xbf16>
    %26 = tpu.concatenate %24, %25 in 1 : vector<36x17xbf16>, vector<36x239xbf16> -> vector<36x256xbf16>
    %cst_7 = arith.constant 0.000000e+00 : bf16
    %27 = vector.broadcast %cst_7 : bf16 to vector<36x256xbf16>
    %28 = vector.shape_cast %20 : vector<1x256xi1> to vector<1x256xi1>
    %29 = vector.broadcast %28 : vector<1x256xi1> to vector<36x256xi1>
    %30 = arith.select %29, %26, %27 : vector<36x256xi1>, vector<36x256xbf16>
    %c0_8 = arith.constant 0 : index
    %c0_9 = arith.constant 0 : index
    %c0_10 = arith.constant 0 : index
    %31 = vector.load %arg3[%c0_8, %c0_9, %c0_10] : memref<9x36x36xbf16, #tpu.memory_space<vmem>>, vector<1x36x36xbf16>
    %32 = vector.shape_cast %31 : vector<1x36x36xbf16> to vector<36x36xbf16>
    %cst_11 = arith.constant dense<0.000000e+00> : vector<36x256xf32>
    %33 = tpu.matmul %32, %30, %cst_11 {dimension_numbers = #tpu.dot_dimension_numbers<[1], [0], [0], [1], [0, 0, 1, 1], [], []>} : vector<36x36xbf16>, vector<36x256xbf16>, vector<36x256xf32> -> vector<36x256xf32>
    %34 = arith.addf %23, %33 : vector<36x256xf32>
    %cst_12 = arith.constant 0.000000e+00 : bf16
    %35 = vector.broadcast %cst_12 : bf16 to vector<36x16xbf16>
    %36 = vector.extract_strided_slice %1 {offsets = [0, 0], sizes = [36, 240], strides = [1, 1]} : vector<36x256xbf16> to vector<36x240xbf16>
    %37 = tpu.concatenate %35, %36 in 1 : vector<36x16xbf16>, vector<36x240xbf16> -> vector<36x256xbf16>
    %c1 = arith.constant 1 : index
    %c0_13 = arith.constant 0 : index
    %c0_14 = arith.constant 0 : index
    %38 = vector.load %arg3[%c1, %c0_13, %c0_14] : memref<9x36x36xbf16, #tpu.memory_space<vmem>>, vector<1x36x36xbf16>
    %39 = vector.shape_cast %38 : vector<1x36x36xbf16> to vector<36x36xbf16>
    %cst_15 = arith.constant dense<0.000000e+00> : vector<36x256xf32>
    %40 = tpu.matmul %39, %37, %cst_15 {dimension_numbers = #tpu.dot_dimension_numbers<[1], [0], [0], [1], [0, 0, 1, 1], [], []>} : vector<36x36xbf16>, vector<36x256xbf16>, vector<36x256xf32> -> vector<36x256xf32>
    %41 = arith.addf %34, %40 : vector<36x256xf32>
    %cst_16 = arith.constant 0.000000e+00 : bf16
    %42 = vector.broadcast %cst_16 : bf16 to vector<36x15xbf16>
    %43 = vector.extract_strided_slice %1 {offsets = [0, 0], sizes = [36, 241], strides = [1, 1]} : vector<36x256xbf16> to vector<36x241xbf16>
    %44 = tpu.concatenate %42, %43 in 1 : vector<36x15xbf16>, vector<36x241xbf16> -> vector<36x256xbf16>
    %cst_17 = arith.constant 0.000000e+00 : bf16
    %45 = vector.broadcast %cst_17 : bf16 to vector<36x256xbf16>
    %46 = vector.shape_cast %22 : vector<1x256xi1> to vector<1x256xi1>
    %47 = vector.broadcast %46 : vector<1x256xi1> to vector<36x256xi1>
    %48 = arith.select %47, %44, %45 : vector<36x256xi1>, vector<36x256xbf16>
    %c2 = arith.constant 2 : index
    %c0_18 = arith.constant 0 : index
    %c0_19 = arith.constant 0 : index
    %49 = vector.load %arg3[%c2, %c0_18, %c0_19] : memref<9x36x36xbf16, #tpu.memory_space<vmem>>, vector<1x36x36xbf16>
    %50 = vector.shape_cast %49 : vector<1x36x36xbf16> to vector<36x36xbf16>
    %cst_20 = arith.constant dense<0.000000e+00> : vector<36x256xf32>
    %51 = tpu.matmul %50, %48, %cst_20 {dimension_numbers = #tpu.dot_dimension_numbers<[1], [0], [0], [1], [0, 0, 1, 1], [], []>} : vector<36x36xbf16>, vector<36x256xbf16>, vector<36x256xf32> -> vector<36x256xf32>
    %52 = arith.addf %41, %51 : vector<36x256xf32>
    %cst_21 = arith.constant 0.000000e+00 : bf16
    %53 = vector.broadcast %cst_21 : bf16 to vector<36x1xbf16>
    %54 = vector.extract_strided_slice %1 {offsets = [0, 0], sizes = [36, 255], strides = [1, 1]} : vector<36x256xbf16> to vector<36x255xbf16>
    %55 = tpu.concatenate %53, %54 in 1 : vector<36x1xbf16>, vector<36x255xbf16> -> vector<36x256xbf16>
    %cst_22 = arith.constant 0.000000e+00 : bf16
    %56 = vector.broadcast %cst_22 : bf16 to vector<36x256xbf16>
    %57 = vector.shape_cast %20 : vector<1x256xi1> to vector<1x256xi1>
    %58 = vector.broadcast %57 : vector<1x256xi1> to vector<36x256xi1>
    %59 = arith.select %58, %55, %56 : vector<36x256xi1>, vector<36x256xbf16>
    %c3 = arith.constant 3 : index
    %c0_23 = arith.constant 0 : index
    %c0_24 = arith.constant 0 : index
    %60 = vector.load %arg3[%c3, %c0_23, %c0_24] : memref<9x36x36xbf16, #tpu.memory_space<vmem>>, vector<1x36x36xbf16>
    %61 = vector.shape_cast %60 : vector<1x36x36xbf16> to vector<36x36xbf16>
    %cst_25 = arith.constant dense<0.000000e+00> : vector<36x256xf32>
    %62 = tpu.matmul %61, %59, %cst_25 {dimension_numbers = #tpu.dot_dimension_numbers<[1], [0], [0], [1], [0, 0, 1, 1], [], []>} : vector<36x36xbf16>, vector<36x256xbf16>, vector<36x256xf32> -> vector<36x256xf32>
    %63 = arith.addf %52, %62 : vector<36x256xf32>
    %c4 = arith.constant 4 : index
    %c0_26 = arith.constant 0 : index
    %c0_27 = arith.constant 0 : index
    %64 = vector.load %arg3[%c4, %c0_26, %c0_27] : memref<9x36x36xbf16, #tpu.memory_space<vmem>>, vector<1x36x36xbf16>
    %65 = vector.shape_cast %64 : vector<1x36x36xbf16> to vector<36x36xbf16>
    %cst_28 = arith.constant dense<0.000000e+00> : vector<36x256xf32>
    %66 = tpu.matmul %65, %1, %cst_28 {dimension_numbers = #tpu.dot_dimension_numbers<[1], [0], [0], [1], [0, 0, 1, 1], [], []>} : vector<36x36xbf16>, vector<36x256xbf16>, vector<36x256xf32> -> vector<36x256xf32>
    %67 = arith.addf %63, %66 : vector<36x256xf32>
    %cst_29 = arith.constant 0.000000e+00 : bf16
    %68 = vector.broadcast %cst_29 : bf16 to vector<36x1xbf16>
    %69 = vector.extract_strided_slice %1 {offsets = [0, 1], sizes = [36, 255], strides = [1, 1]} : vector<36x256xbf16> to vector<36x255xbf16>
    %70 = tpu.concatenate %69, %68 in 1 : vector<36x255xbf16>, vector<36x1xbf16> -> vector<36x256xbf16>
    %cst_30 = arith.constant 0.000000e+00 : bf16
    %71 = vector.broadcast %cst_30 : bf16 to vector<36x256xbf16>
    %72 = vector.shape_cast %22 : vector<1x256xi1> to vector<1x256xi1>
    %73 = vector.broadcast %72 : vector<1x256xi1> to vector<36x256xi1>
    %74 = arith.select %73, %70, %71 : vector<36x256xi1>, vector<36x256xbf16>
    %c5 = arith.constant 5 : index
    %c0_31 = arith.constant 0 : index
    %c0_32 = arith.constant 0 : index
    %75 = vector.load %arg3[%c5, %c0_31, %c0_32] : memref<9x36x36xbf16, #tpu.memory_space<vmem>>, vector<1x36x36xbf16>
    %76 = vector.shape_cast %75 : vector<1x36x36xbf16> to vector<36x36xbf16>
    %cst_33 = arith.constant dense<0.000000e+00> : vector<36x256xf32>
    %77 = tpu.matmul %76, %74, %cst_33 {dimension_numbers = #tpu.dot_dimension_numbers<[1], [0], [0], [1], [0, 0, 1, 1], [], []>} : vector<36x36xbf16>, vector<36x256xbf16>, vector<36x256xf32> -> vector<36x256xf32>
    %78 = arith.addf %67, %77 : vector<36x256xf32>
    %cst_34 = arith.constant 0.000000e+00 : bf16
    %79 = vector.broadcast %cst_34 : bf16 to vector<36x15xbf16>
    %80 = vector.extract_strided_slice %1 {offsets = [0, 15], sizes = [36, 241], strides = [1, 1]} : vector<36x256xbf16> to vector<36x241xbf16>
    %81 = tpu.concatenate %80, %79 in 1 : vector<36x241xbf16>, vector<36x15xbf16> -> vector<36x256xbf16>
    %cst_35 = arith.constant 0.000000e+00 : bf16
    %82 = vector.broadcast %cst_35 : bf16 to vector<36x256xbf16>
    %83 = vector.shape_cast %20 : vector<1x256xi1> to vector<1x256xi1>
    %84 = vector.broadcast %83 : vector<1x256xi1> to vector<36x256xi1>
    %85 = arith.select %84, %81, %82 : vector<36x256xi1>, vector<36x256xbf16>
    %c6 = arith.constant 6 : index
    %c0_36 = arith.constant 0 : index
    %c0_37 = arith.constant 0 : index
    %86 = vector.load %arg3[%c6, %c0_36, %c0_37] : memref<9x36x36xbf16, #tpu.memory_space<vmem>>, vector<1x36x36xbf16>
    %87 = vector.shape_cast %86 : vector<1x36x36xbf16> to vector<36x36xbf16>
    %cst_38 = arith.constant dense<0.000000e+00> : vector<36x256xf32>
    %88 = tpu.matmul %87, %85, %cst_38 {dimension_numbers = #tpu.dot_dimension_numbers<[1], [0], [0], [1], [0, 0, 1, 1], [], []>} : vector<36x36xbf16>, vector<36x256xbf16>, vector<36x256xf32> -> vector<36x256xf32>
    %89 = arith.addf %78, %88 : vector<36x256xf32>
    %cst_39 = arith.constant 0.000000e+00 : bf16
    %90 = vector.broadcast %cst_39 : bf16 to vector<36x16xbf16>
    %91 = vector.extract_strided_slice %1 {offsets = [0, 16], sizes = [36, 240], strides = [1, 1]} : vector<36x256xbf16> to vector<36x240xbf16>
    %92 = tpu.concatenate %91, %90 in 1 : vector<36x240xbf16>, vector<36x16xbf16> -> vector<36x256xbf16>
    %c7 = arith.constant 7 : index
    %c0_40 = arith.constant 0 : index
    %c0_41 = arith.constant 0 : index
    %93 = vector.load %arg3[%c7, %c0_40, %c0_41] : memref<9x36x36xbf16, #tpu.memory_space<vmem>>, vector<1x36x36xbf16>
    %94 = vector.shape_cast %93 : vector<1x36x36xbf16> to vector<36x36xbf16>
    %cst_42 = arith.constant dense<0.000000e+00> : vector<36x256xf32>
    %95 = tpu.matmul %94, %92, %cst_42 {dimension_numbers = #tpu.dot_dimension_numbers<[1], [0], [0], [1], [0, 0, 1, 1], [], []>} : vector<36x36xbf16>, vector<36x256xbf16>, vector<36x256xf32> -> vector<36x256xf32>
    %96 = arith.addf %89, %95 : vector<36x256xf32>
    %cst_43 = arith.constant 0.000000e+00 : bf16
    %97 = vector.broadcast %cst_43 : bf16 to vector<36x17xbf16>
    %98 = vector.extract_strided_slice %1 {offsets = [0, 17], sizes = [36, 239], strides = [1, 1]} : vector<36x256xbf16> to vector<36x239xbf16>
    %99 = tpu.concatenate %98, %97 in 1 : vector<36x239xbf16>, vector<36x17xbf16> -> vector<36x256xbf16>
    %cst_44 = arith.constant 0.000000e+00 : bf16
    %100 = vector.broadcast %cst_44 : bf16 to vector<36x256xbf16>
    %101 = vector.shape_cast %22 : vector<1x256xi1> to vector<1x256xi1>
    %102 = vector.broadcast %101 : vector<1x256xi1> to vector<36x256xi1>
    %103 = arith.select %102, %99, %100 : vector<36x256xi1>, vector<36x256xbf16>
    %c8 = arith.constant 8 : index
    %c0_45 = arith.constant 0 : index
    %c0_46 = arith.constant 0 : index
    %104 = vector.load %arg3[%c8, %c0_45, %c0_46] : memref<9x36x36xbf16, #tpu.memory_space<vmem>>, vector<1x36x36xbf16>
    %105 = vector.shape_cast %104 : vector<1x36x36xbf16> to vector<36x36xbf16>
    %cst_47 = arith.constant dense<0.000000e+00> : vector<36x256xf32>
    %106 = tpu.matmul %105, %103, %cst_47 {dimension_numbers = #tpu.dot_dimension_numbers<[1], [0], [0], [1], [0, 0, 1, 1], [], []>} : vector<36x36xbf16>, vector<36x256xbf16>, vector<36x256xf32> -> vector<36x256xf32>
    %107 = arith.addf %96, %106 : vector<36x256xf32>
    %cst_48 = arith.constant 0.000000e+00 : f32
    %108 = vector.broadcast %cst_48 : f32 to vector<36x256xf32>
    %109 = arith.cmpf oge, %107, %108 : vector<36x256xf32>
    %cst_49 = arith.constant 2.000000e-01 : f32
    %110 = vector.broadcast %cst_49 : f32 to vector<36x256xf32>
    %111 = arith.mulf %110, %107 : vector<36x256xf32>
    %112 = arith.select %109, %107, %111 : vector<36x256xi1>, vector<36x256xf32>
    %c0_50 = arith.constant 0 : index
    %c0_51 = arith.constant 0 : index
    %113 = vector.load %arg4[%c0_50, %c0_51] : memref<36x36xbf16, #tpu.memory_space<vmem>>, vector<36x36xbf16>
    %114 = arith.truncf %112 : vector<36x256xf32> to vector<36x256xbf16>
    %cst_52 = arith.constant dense<0.000000e+00> : vector<36x256xf32>
    %115 = tpu.matmul %113, %114, %cst_52 {dimension_numbers = #tpu.dot_dimension_numbers<[1], [0], [0], [1], [0, 0, 1, 1], [], []>} : vector<36x36xbf16>, vector<36x256xbf16>, vector<36x256xf32> -> vector<36x256xf32>
    %cst_53 = arith.constant 0.000000e+00 : f32
    %116 = vector.broadcast %cst_53 : f32 to vector<36x256xf32>
    %117 = arith.cmpf oge, %115, %116 : vector<36x256xf32>
    %cst_54 = arith.constant 2.000000e-01 : f32
    %118 = vector.broadcast %cst_54 : f32 to vector<36x256xf32>
    %119 = arith.mulf %118, %115 : vector<36x256xf32>
    %120 = arith.select %117, %115, %119 : vector<36x256xi1>, vector<36x256xf32>
    %c0_55 = arith.constant 0 : index
    %c0_56 = arith.constant 0 : index
    %121 = vector.load %arg5[%c0_55, %c0_56] : memref<36x40xbf16, #tpu.memory_space<vmem>>, vector<36x40xbf16>
    %c0_57 = arith.constant 0 : index
    %c0_58 = arith.constant 0 : index
    %c0_59 = arith.constant 0 : index
    %122 = vector.load %arg1[%c0_57, %c0_58, %c0_59] : memref<1x40x256xbf16, #tpu.memory_space<vmem>>, vector<1x40x256xbf16>
    %123 = vector.shape_cast %122 : vector<1x40x256xbf16> to vector<40x256xbf16>
    %cst_60 = arith.constant dense<0.000000e+00> : vector<36x256xf32>
    %124 = tpu.matmul %121, %123, %cst_60 {dimension_numbers = #tpu.dot_dimension_numbers<[1], [0], [0], [1], [0, 0, 1, 1], [], []>} : vector<36x40xbf16>, vector<40x256xbf16>, vector<36x256xf32> -> vector<36x256xf32>
    %c0_61 = arith.constant 0 : index
    %c0_62 = arith.constant 0 : index
    %125 = vector.load %arg6[%c0_61, %c0_62] : memref<36x1xf32, #tpu.memory_space<vmem>>, vector<36x1xf32>
    %126 = vector.broadcast %125 : vector<36x1xf32> to vector<36x256xf32>
    %127 = arith.addf %124, %126 : vector<36x256xf32>
    %c0_63 = arith.constant 0 : index
    %c0_64 = arith.constant 0 : index
    %128 = vector.load %arg7[%c0_63, %c0_64] : memref<36x1xf32, #tpu.memory_space<vmem>>, vector<36x1xf32>
    %129 = vector.broadcast %128 : vector<36x1xf32> to vector<36x256xf32>
    %130 = arith.mulf %127, %129 : vector<36x256xf32>
    %c0_65 = arith.constant 0 : index
    %c0_66 = arith.constant 0 : index
    %131 = vector.load %arg8[%c0_65, %c0_66] : memref<36x1xf32, #tpu.memory_space<vmem>>, vector<36x1xf32>
    %132 = vector.broadcast %131 : vector<36x1xf32> to vector<36x256xf32>
    %133 = arith.addf %130, %132 : vector<36x256xf32>
    %134 = arith.addf %133, %120 : vector<36x256xf32>
    %c0_67 = arith.constant 0 : index
    %c0_68 = arith.constant 0 : index
    %c0_69 = arith.constant 0 : index
    %135 = vector.load %arg9[%c0_67, %c0_68, %c0_69] : memref<1x36x256xf32, #tpu.memory_space<vmem>>, vector<1x36x256xf32>
    %136 = vector.shape_cast %135 : vector<1x36x256xf32> to vector<36x256xf32>
    %137 = vector.shape_cast %134 : vector<36x256xf32> to vector<1x36x256xf32>
    tpu.vector_store %arg9[%c0_67, %c0_68, %c0_69], %137 {strides = array<i32>} : memref<1x36x256xf32, #tpu.memory_space<vmem>>, vector<1x36x256xf32>,
    return
  }
  func.func @transform_0(%arg0: i32) -> (i32, i32, i32) {
    %c0_i32 = arith.constant 0 : i32
    %c0_i32_0 = arith.constant 0 : i32
    %c0_i32_1 = arith.constant 0 : i32
    return %arg0, %c0_i32, %c0_i32_0 : i32, i32, i32
  }
  func.func @transform_1(%arg0: i32) -> (i32, i32, i32) {
    %c0_i32 = arith.constant 0 : i32
    %c0_i32_0 = arith.constant 0 : i32
    %c0_i32_1 = arith.constant 0 : i32
    return %arg0, %c0_i32, %c0_i32_0 : i32, i32, i32
  }
  func.func @transform_2(%arg0: i32) -> (i32, i32, i32) {
    %c0_i32 = arith.constant 0 : i32
    %c0_i32_0 = arith.constant 0 : i32
    %c0_i32_1 = arith.constant 0 : i32
    %c0_i32_2 = arith.constant 0 : i32
    return %c0_i32, %c0_i32_0, %c0_i32_1 : i32, i32, i32
  }
  func.func @transform_3(%arg0: i32) -> (i32, i32) {
    %c0_i32 = arith.constant 0 : i32
    %c0_i32_0 = arith.constant 0 : i32
    %c0_i32_1 = arith.constant 0 : i32
    return %c0_i32, %c0_i32_0 : i32, i32
  }
  func.func @transform_4(%arg0: i32) -> (i32, i32) {
    %c0_i32 = arith.constant 0 : i32
    %c0_i32_0 = arith.constant 0 : i32
    %c0_i32_1 = arith.constant 0 : i32
    return %c0_i32, %c0_i32_0 : i32, i32
  }
  func.func @transform_5(%arg0: i32) -> (i32, i32) {
    %c0_i32 = arith.constant 0 : i32
    %c0_i32_0 = arith.constant 0 : i32
    %c0_i32_1 = arith.constant 0 : i32
    return %c0_i32, %c0_i32_0 : i32, i32
  }
  func.func @transform_6(%arg0: i32) -> (i32, i32) {
    %c0_i32 = arith.constant 0 : i32
    %c0_i32_0 = arith.constant 0 : i32
    %c0_i32_1 = arith.constant 0 : i32
    return %c0_i32, %c0_i32_0 : i32, i32
  }
  func.func @transform_7(%arg0: i32) -> (i32, i32) {
    %c0_i32 = arith.constant 0 : i32
    %c0_i32_0 = arith.constant 0 : i32
    %c0_i32_1 = arith.constant 0 : i32
    return %c0_i32, %c0_i32_0 : i32, i32
  }
  func.func @transform_8(%arg0: i32) -> (i32, i32, i32) {
    %c0_i32 = arith.constant 0 : i32
    %c0_i32_0 = arith.constant 0 : i32
    %c0_i32_1 = arith.constant 0 : i32
    return %arg0, %c0_i32, %c0_i32_0 : i32, i32, i32
  }
}

</mosaic_0001>

<bundles_post_ra>
// kernel: residual_block_forward.2
= control target key start
LH: loop header
LB: loop body
LE: loop exit
PB: predicated region body
PF: predicated region fallthrough
CT: control target
= control target key end

     0   :  { %s800_s18 = smov 0   ;;  %s891_s0 = inlined_call_operand.vmem [shape: bf16[2,40,256], index: 0, kind: input, shape index: {}]   ;;  %s892_s1 = inlined_call_operand.vmem [shape: bf16[36,40], index: 1, kind: input, shape index: {}]   ;;  %s893_s2 = inlined_call_operand.vmem [shape: bf16[36,40], index: 2, kind: input, shape index: {}]   ;;  %s894_s3 = inlined_call_operand.vmem [shape: f32[36,1], index: 3, kind: input, shape index: {}]   ;;  %s895_s4 = inlined_call_operand.vmem [shape: bf16[2,36,256], index: 4, kind: output, shape index: {0}]   ;;  %s896_s5 = inlined_call_operand.vmem [shape: f32[2,36,2], index: 5, kind: output, shape index: {1}]  }
   0x1 LB: > { %s695_s19 = sadd.s32 4294967295, %s767_s18   ;;  %p699_p0 = scmp.ge.s32.totalorder %s767_s18, 1  ;;  %s767_s18 = sphi %s800_s18, %s16_s18  }
   0x2   : > { %p190_p1 = scmp.lt.s32.totalorder %s767_s18, 3 }
   0x4   : > { %p191_p2 = pnand %p699_p0, %p190_p1 }
   0x5   : > { %p223_p3 = scmp.lt.s32.totalorder (!%p191_p2), %s695_s19, 1  ;;  %v769_v0 = vmov (!%p191_p2), 0   ;;  %v441_v1 = vld [vmem:[%s894_s3 + $0x20] sm:$0xf] (!%p191_p2)  ;;  %v438_v2 = vld [vmem:[%s894_s3 + $0x8] sm:$0xff] (!%p191_p2)  ;;  %v439_v4 = vld [vmem:[%s894_s3 + $0x10] sm:$0xff] (!%p191_p2) }
   0x6   : > { %194 = sbr.rel (%p191_p2) target bundleno = 412 (0x19c), region = 36  ;;  %521 = vmatprep.mubr.bf16.mxu1 (!%p191_p2), %v769_v0  ;;  %745 = vset.pattern.permute.xlu0 (!%p191_p2), %v769_v0  ;;  %v437_v3 = vld [vmem:[%s894_s3] sm:$0xff] (!%p191_p2)  ;;  %v440_v9 = vld [vmem:[%s894_s3 + $0x18] sm:$0xff] (!%p191_p2)  ;;  %vm297_vm0 = vcmask (!%p191_p2), 1043456   ;;  %vm287_vm1 = vcmask (!%p191_p2), 326656   ;;  %v756_v16 = vld [vmem:[%s893_s2 + $0x8] sm:$0xff] (!%p191_p2)  }
   0x7   : > { %746 = vset.pattern.permute.xlu1 (!%p191_p2), %v769_v0  ;;  %336 = vmatprep.mubr.bf16.mxu0 (!%p191_p2), %v769_v0  ;;  %v755_v14 = vld [vmem:[%s893_s2] sm:$0xff] (!%p191_p2)   ;;  %v759_v17 = vld [vmem:[%s892_s1 + $0x8] sm:$0xff] (!%p191_p2)   ;;  %v757_v18 = vld [vmem:[%s893_s2 + $0x10] ss:$0 sps:$4 sm:$0x33] (!%p191_p2)   ;;  %vm594_vm12 = vcmask (!%p191_p2), 7168  }
   0x8   : > { %464 = vperm.xlu0 (!%p191_p2), %745, %v441_v1   ;;  %449 = vperm.xlu1 (!%p191_p2), %746, %v438_v2   ;;  %v758_v15 = vld [vmem:[%s892_s1] sm:$0xff] (!%p191_p2)   ;;  %v760_v19 = vld [vmem:[%s892_s1 + $0x10] ss:$0 sps:$4 sm:$0x33] (!%p191_p2)   ;;  %vm600_vm13 = vcmask (!%p191_p2), 15360   ;;  %vm605_vm14 = vcmask (!%p191_p2), 11264  }
   0xc   : > { %444 = vperm.xlu0 (!%p191_p2), %745, %v437_v3   ;;  %454 = vperm.xlu1 (!%p191_p2), %746, %v439_v4  }
   0xd   : > { %s898_s19 = smov (!%p223_p3, %s695_s19), 1 }
   0xe   : > { %s811_s22 = smul.u32 40, %s898_s19 }
  0x10   : > { %s227_s29 = scalar_lea.vmem %s891_s0, %s811_s22  ;;  %459 = vperm.xlu0 %745, %v440_v9   ;;  %s862_s25 = scalar_lea.vmem %s895_s4, %s811_s22 }
  0x11   : > { %v747_v5 = vld [vmem:[%s227_s29 + $0x4] ss:$8 sps:$4 sm:$0xff]   ;;  %v749_v6 = vld [vmem:[%s227_s29] ss:$8 sps:$4 sm:$0xff]   ;;  %v750_v7 = vld [vmem:[%s227_s29 + $0x14] ss:$8 sps:$4 sm:$0xff]   ;;  %s237_s28 = scalar_lea.vmem %s896_s5, %s811_s22 }
  0x12   : > { %489 = vmatprep.subr.bf16.mxu1 %v747_v5  ;;  %v243_v8 = vld [vmem:[%s227_s29 + $0x20] sm:$0xff]  ;;  %v752_v10 = vld [vmem:[%s227_s29 + $0x10] ss:$8 sps:$4 sm:$0xff]   ;;  %304 = vmatprep.subr.bf16.mxu0 %v747_v5 }
  0x13   : > { %490 = vmatpush1.bf16.msra.mxu1 %v749_v6  ;;  %v711_v11 = vcombine.high %v243_v8, %v243_v8  ;;  %v710_v12 = vcombine.low %v243_v8, %v243_v8  ;;  %305 = vmatpush1.bf16.msra.mxu0 %v749_v6 }
  0x14   : > { %491 = vmatprep.subr.bf16.mxu1 %v750_v7  ;;  %306 = vmatprep.subr.bf16.mxu0 %v750_v7 }
  0x15   : > { %v299_v13 = vsel %vm297_vm0, %v710_v12, 0 }
  0x17   : > { %492 = vmatpush1.bf16.msra.mxu1 %v752_v10  ;;  %307 = vmatpush1.bf16.msra.mxu0 %v752_v10 }
  0x18   : > { %724 = vmatprep.subr.msk.bf16.mxu1 %vm297_vm0, %v711_v11  ;;  %712 = vmatprep.subr.msk.bf16.mxu0 %vm297_vm0, %v711_v11 }
  0x1b   : > { %494 = vmatpush1.bf16.msra.mxu1 %v299_v13  ;;  %309 = vmatpush1.bf16.msra.mxu0 %v299_v13 }
  0x1e   : > { %725 = vmatmul.mubr.msk.bf16.vlgmr.msra.gmra.mrb[0].mxu1 %vm287_vm1, %v755_v14  ;;  %713 = vmatmul.mubr.msk.bf16.vlgmr.msra.gmra.mrb[0].mxu0 %vm287_vm1, %v758_v15 }
  0x1f   : > { %531 = vmatprep.mubr.bf16.mxu1 %v769_v0  ;;  %346 = vmatprep.mubr.bf16.mxu0 %v769_v0 }
  0x26   : > { %726 = vmatmul.mubr.msk.bf16.gmra.mrb[4].mxu1 %vm287_vm1, %v756_v16  ;;  %714 = vmatmul.mubr.msk.bf16.gmra.mrb[4].mxu0 %vm287_vm1, %v759_v17 }
  0x27   : > { %541 = vmatprep.mubr.bf16.mxu1 %v769_v0  ;;  %356 = vmatprep.mubr.bf16.mxu0 %v769_v0 }
  0x2e   : > { %727 = vmatmul.mubr.msk.bf16.gmra.mrb[8].mxu1 %vm287_vm1, %v757_v18  ;;  %715 = vmatmul.mubr.msk.bf16.gmra.mrb[8].mxu0 %vm287_vm1, %v760_v19 }
  0x87   : > { %v856_v20 = vpop.permute.xlu0 %464  ;;  %v450_v21 = vpop.permute.xlu1 %449 }
  0x8b   : > { %v445_v22 = vpop.permute.xlu0 %444  ;;  %v455_v50 = vpop.permute.xlu1 %454 }
  0x8f   : > { %v460_v56 = vpop.permute.xlu0 %459 }
  0xf1   : > { %v523_v23 = vpop.f32.mrb[0].mxu1  ;;  %v338_v26 = vpop.f32.mrb[0].mxu0 }
  0xf2   : > { %v524_v24 = vadd.f32 %v523_v23, %v445_v22  ;;  %v525_v25 = vpop.f32.mrb[1].mxu1  ;;  %vm365_vm2 = vcmp.ge.f32.partialorder %v338_v26, 0.0  ;;  %v375_v29 = vmul.f32 0.2, %v338_v26  ;;  %v340_v30 = vpop.f32.mrb[1].mxu0 }
  0xf3   : > { %v526_v27 = vadd.f32 %v525_v25, %v445_v22  ;;  %v527_v28 = vpop.f32.mrb[2].mxu1  ;;  %vm366_vm3 = vcmp.ge.f32.partialorder %v340_v30, 0.0  ;;  %v376_v34 = vmul.f32 0.2, %v340_v30  ;;  %v342_v35 = vpop.f32.mrb[2].mxu0 }
  0xf4   : > { %v567_v31 = vmul.f32 %v524_v24, %v524_v24  ;;  %v528_v32 = vadd.f32 %v527_v28, %v450_v21  ;;  %v529_v33 = vpop.f32.mrb[3].mxu1  ;;  %v385_v39 = vsel %vm365_vm2, %v338_v26, %v375_v29  ;;  %v344_v40 = vpop.f32.mrb[3].mxu0  ;;  %vm367_vm4 = vcmp.ge.f32.partialorder %v342_v35, 0.0 }
  0xf5   : > { %v568_v36 = vmul.f32 %v526_v27, %v526_v27  ;;  %v530_v37 = vadd.f32 %v529_v33, %v450_v21  ;;  %v550_v38 = vadd.f32 %v526_v27, %v524_v24  ;;  %v386_v42 = vsel %vm366_vm3, %v340_v30, %v376_v34 }
  0xf6   : > { %v569_v41 = vmul.f32 %v528_v32, %v528_v32  ;;  %v377_v43 = vmul.f32 0.2, %v342_v35  ;;  %v730_v47 = vpack.c.bf16 %v386_v42, %v385_v39  ;;  %vm368_vm5 = vcmp.ge.f32.partialorder %v344_v40, 0.0 }
  0xf7   : > { %v570_v44 = vmul.f32 %v530_v37, %v530_v37  ;;  %551 = vadd.xlane.f32.xlu1 %v550_v38  ;;  %v553_v45 = vadd.f32 %v530_v37, %v528_v32  ;;  %v577_v46 = vadd.f32 %v568_v36, %v567_v31  ;;  %v378_v49 = vmul.f32 0.2, %v344_v40 }
  0xf8   : > { %v387_v48 = vsel %vm367_vm4, %v342_v35, %v377_v43  ;;  %427 = vst [vmem:[%s862_s25] sm:$0xff] %v730_v47 }
  0xf9   : > { %v533_v51 = vpop.f32.mrb[4].mxu1  ;;  %554 = vadd.xlane.f32.xlu0 %v553_v45  ;;  %v580_v52 = vadd.f32 %v570_v44, %v569_v41  ;;  %v388_v55 = vsel %vm368_vm5, %v344_v40, %v378_v49  ;;  %v348_v19 = vpop.f32.mrb[4].mxu0 }
  0xfa   : > { %v534_v53 = vadd.f32 %v533_v51, %v455_v50  ;;  %v535_v54 = vpop.f32.mrb[5].mxu1  ;;  %v731_v59 = vpack.c.bf16 %v388_v55, %v387_v48  ;;  %vm369_vm6 = vcmp.ge.f32.partialorder %v348_v19, 0.0  ;;  %v379_v22 = vmul.f32 0.2, %v348_v19 }
  0xfb   : > { %v536_v57 = vadd.f32 %v535_v54, %v455_v50  ;;  %v537_v58 = vpop.f32.mrb[6].mxu1  ;;  %578 = vadd.xlane.f32.xlu1 %v577_v46 }
  0xfc   : > { %v571_v60 = vmul.f32 %v534_v53, %v534_v53  ;;  %v538_v61 = vadd.f32 %v537_v58, %v460_v56  ;;  %v539_v62 = vpop.f32.mrb[7].mxu1  ;;  %428 = vst [vmem:[%s862_s25 + $0x8] sm:$0xff] %v731_v59  ;;  %v389_v24 = vsel %vm369_vm6, %v348_v19, %v379_v22 }
  0xfd   : > { %v572_v63 = vmul.f32 %v536_v57, %v536_v57  ;;  %v540_v0 = vadd.f32 %v539_v62, %v460_v56  ;;  %581 = vadd.xlane.f32.xlu0 %v580_v52  ;;  %v556_v1 = vadd.f32 %v536_v57, %v534_v53 }
  0xfe   : > { %v573_v2 = vmul.f32 %v538_v61, %v538_v61 }
  0xff   : > { %v574_v3 = vmul.f32 %v540_v0, %v540_v0  ;;  %v559_v4 = vadd.f32 %v540_v0, %v538_v61  ;;  %v583_v5 = vadd.f32 %v572_v63, %v571_v60 }
 0x101   : > { %v543_v6 = vpop.f32.mrb[8].mxu1  ;;  %557 = vadd.xlane.f32.xlu0 %v556_v1  ;;  %560 = vadd.xlane.f32.xlu1 %v559_v4  ;;  %v586_v7 = vadd.f32 %v574_v3, %v573_v2 }
 0x102   : > { %v544_v8 = vadd.f32 %v543_v6, %v856_v20  ;;  %v545_v9 = vpop.f32.mrb[9].mxu1 }
 0x103   : > { %v546_v10 = vadd.f32 %v545_v9, %v856_v20  ;;  %v547_v11 = vpop.f32.mrb[10].mxu1  ;;  %v350_v20 = vpop.f32.mrb[5].mxu0 }
 0x104   : > { %v575_v12 = vmul.f32 %v544_v8, %v544_v8  ;;  %v548_v13 = vpop.f32.mrb[11].mxu1  ;;  %v562_v14 = vsel %vm297_vm0, %v544_v8, 0.0  ;;  %v352_v25 = vpop.f32.mrb[6].mxu0  ;;  %vm370_vm7 = vcmp.ge.f32.partialorder %v350_v20, 0.0  ;;  %v380_v26 = vmul.f32 0.2, %v350_v20 }
 0x105   : > { %v576_v15 = vmul.f32 %v546_v10, %v546_v10  ;;  %584 = vadd.xlane.f32.xlu1 %v583_v5  ;;  %v563_v16 = vsel %vm297_vm0, %v546_v10, 0.0  ;;  %vm371_vm8 = vcmp.ge.f32.partialorder %v352_v25, 0.0  ;;  %v381_v27 = vmul.f32 0.2, %v352_v25  ;;  %v354_v28 = vpop.f32.mrb[7].mxu0 }
 0x106   : > { %v564_v17 = vadd.f32 %v563_v16, %v562_v14  ;;  %v589_v18 = vsel %vm297_vm0, %v575_v12, 0.0  ;;  %v390_v29 = vsel %vm370_vm7, %v350_v20, %v380_v26  ;;  %vm372_vm9 = vcmp.ge.f32.partialorder %v354_v28, 0.0  ;;  %v358_v34 = vpop.f32.mrb[8].mxu0 }
 0x107   : > { %v590_v21 = vsel %vm297_vm0, %v576_v15, 0.0  ;;  %v391_v30 = vsel %vm371_vm8, %v352_v25, %v381_v27  ;;  %v382_v31 = vmul.f32 0.2, %v354_v28  ;;  %v732_v32 = vpack.c.bf16 %v390_v29, %v389_v24  ;;  %v360_v37 = vpop.f32.mrb[9].mxu0 }
 0x108   : > { %565 = vadd.xlane.f32.xlu0 %v564_v17  ;;  %v591_v23 = vadd.f32 %v590_v21, %v589_v18  ;;  %v383_v36 = vmul.f32 0.2, %v358_v34  ;;  %vm373_vm10 = vcmp.ge.f32.partialorder %v358_v34, 0.0  ;;  %v384_v39 = vmul.f32 0.2, %v360_v37  ;;  %v362_v40 = vpop.f32.mrb[10].mxu0 }
 0x109   : > { %v392_v33 = vsel %vm372_vm9, %v354_v28, %v382_v31  ;;  %429 = vst [vmem:[%s862_s25 + $0x10] sm:$0xff] %v732_v32  ;;  %vm374_vm11 = vcmp.ge.f32.partialorder %v360_v37, 0.0  ;;  %v363_v41 = vpop.f32.mrb[11].mxu0 }
 0x10a   : > { %592 = vadd.xlane.f32.xlu1 %v591_v23  ;;  %v733_v35 = vpack.c.bf16 %v392_v33, %v391_v30  ;;  %v393_v38 = vsel %vm373_vm10, %v358_v34, %v383_v36  ;;  %v394_v42 = vsel %vm374_vm11, %v360_v37, %v384_v39 }
 0x10b   : > { %v734_v43 = vpack.c.bf16 %v394_v42, %v393_v38 }
 0x10c   : > { %587 = vadd.xlane.f32.xlu0 %v586_v7  ;;  %430 = vst [vmem:[%s862_s25 + $0x18] sm:$0xff] %v733_v35 }
 0x10d   : > { %431 = vst [vmem:[%s862_s25 + $0x20] sm:$0x33] %v734_v43 }
 0x184   : > { %v552_v44 = vpop.xlane.xlu1 %551 }
 0x186   : > { %v555_v45 = vpop.xlane.xlu0 %554 }
 0x188   : > { %v579_v46 = vpop.xlane.xlu1 %578 }
 0x189   : > { %v595_v47 = vsel %vm594_vm12, %v552_v44, %v579_v46 }
 0x18a   : > { %601 = vst.msk [vmem:[%s237_s28] sm:$0xff] %vm600_vm13, %v595_v47  ;;  %v582_v48 = vpop.xlane.xlu0 %581 }
 0x18b   : > { %v596_v49 = vsel %vm594_vm12, %v555_v45, %v582_v48 }
 0x18c   : > { %602 = vst.msk [vmem:[%s237_s28 + $0x8] sm:$0xff] %vm600_vm13, %v596_v49 }
 0x18e   : > { %v561_v50 = vpop.xlane.xlu1 %560  ;;  %v558_v51 = vpop.xlane.xlu0 %557 }
 0x192   : > { %v585_v52 = vpop.xlane.xlu1 %584 }
 0x193   : > { %v597_v53 = vsel %vm594_vm12, %v558_v51, %v585_v52 }
 0x194   : > { %603 = vst.msk [vmem:[%s237_s28 + $0x10] sm:$0xff] %vm600_vm13, %v597_v53 }
 0x195   : > { %v566_v54 = vpop.xlane.xlu0 %565 }
 0x197   : > { %v593_v55 = vpop.xlane.xlu1 %592 }
 0x198   : > { %v599_v56 = vsel %vm594_vm12, %v566_v54, %v593_v55 }
 0x199   : > { %606 = vst.msk [vmem:[%s237_s28 + $0x20] sm:$0xf] %vm605_vm14, %v599_v56  ;;  %v588_v57 = vpop.xlane.xlu0 %587 }
 0x19a   : > { %v598_v58 = vsel %vm594_vm12, %v561_v50, %v588_v57 }
 0x19b   : > { %604 = vst.msk [vmem:[%s237_s28 + $0x18] sm:$0xff] %vm600_vm13, %v598_v58 }
 0x19c PF: > { %s16_s18 = sadd.s32 1, %s767_s18  }
 0x19d   : > { %p13_p4 = scmp.ge.s32.totalorder %s16_s18, 4  }
 0x19f   :  { %15 = sbr.rel (!%p13_p4) target bundleno = 1 (0x1), region = 78 }

// kernel: residual_block_forward.3
= control target key start
LH: loop header
LB: loop body
LE: loop exit
PB: predicated region body
PF: predicated region fallthrough
CT: control target
= control target key end

     0   :  { %s2483_s27 = smov 0   ;;  %s3047_s0 = inlined_call_operand.vmem [shape: bf16[2,40,256], index: 0, kind: input, shape index: {}]   ;;  %s3048_s1 = inlined_call_operand.vmem [shape: bf16[2,36,256], index: 1, kind: input, shape index: {}]   ;;  %s3049_s2 = inlined_call_operand.vmem [shape: bf16[9,36,36], index: 2, kind: input, shape index: {}]   ;;  %s3050_s3 = inlined_call_operand.vmem [shape: bf16[36,36], index: 3, kind: input, shape index: {}]   ;;  %s3051_s4 = inlined_call_operand.vmem [shape: bf16[36,40], index: 4, kind: input, shape index: {}]   ;;  %s3052_s5 = inlined_call_operand.vmem [shape: f32[36,1], index: 5, kind: input, shape index: {}]   ;;  %s3053_s6 = inlined_call_operand.vmem [shape: f32[36,1], index: 6, kind: input, shape index: {}]   ;;  %s3054_s7 = inlined_call_operand.vmem [shape: f32[36,1], index: 7, kind: input, shape index: {}]   ;;  %s3055_s8 = inlined_call_operand.vmem [shape: f32[2,36,256], index: 8, kind: output, shape index: {}]  }
   0x1 LB: > { %s2094_s28 = sadd.s32 4294967295, %s2427_s27   ;;  %p2098_p0 = scmp.ge.s32.totalorder %s2427_s27, 1  ;;  %s2427_s27 = sphi %s2483_s27, %s18_s27  }
   0x2   : > { %p272_p1 = scmp.lt.s32.totalorder %s2427_s27, 3 }
   0x4   : > { %p273_p2 = pnand %p2098_p0, %p272_p1 }
   0x5   : > { %p311_p3 = scmp.lt.s32.totalorder (!%p273_p2), %s2094_s28, 1  ;;  %v2429_v0 = vmov (!%p273_p2), 0   ;;  %s2430_s11 = smov (!%p273_p2), 1   ;;  %v334_v8 = vlaneseq (!%p273_p2)  ;;  %vm823_vm3 = vcmask (!%p273_p2), 7168   ;;  %vm499_vm6 = vcmask (!%p273_p2), 1041408   ;;  %v2380_v38 = vld [vmem:[%s3049_s2 + $0x3c] sm:$0xff] (!%p273_p2)  }
   0x6   : > { %276 = sbr.rel (%p273_p2) target bundleno = 764 (0x2fc), region = 52  ;;  %912 = vmatprep.mubr.bf16.mxu0 (!%p273_p2), %v2429_v0  ;;  %537 = vmatprep.mubr.bf16.mxu1 (!%p273_p2), %v2429_v0  ;;  %s2431_s12 = smov (!%p273_p2), 127   ;;  %vm489_vm10 = vcmask (!%p273_p2), 293888   ;;  %vm455_vm11 = vcmask (!%p273_p2), 130048   ;;  %vm1072_vm12 = vcmask (!%p273_p2), 1039360   ;;  %v2381_v45 = vld [vmem:[%s3049_s2 + $0x44] sm:$0xff] (!%p273_p2)  }
   0x7   : > { %2371 = vset.pattern.permute.xlu1 (!%p273_p2), %v2429_v0  ;;  %2370 = vset.pattern.permute.xlu0 (!%p273_p2), %v2429_v0  ;;  %s2432_s13 = smov (!%p273_p2), 16   ;;  %s2433_s14 = smov (!%p273_p2), 113   ;;  %v335_v9 = vand.u32 (!%p273_p2), 127, %v334_v8  ;;  %v2563_v13 = vshrl.u32 (!%p273_p2), %v334_v8, 7  ;;  %vm2628_vm13 = vmneg (!%p273_p2), %vm455_vm11  ;;  %v2382_v57 = vld [vmem:[%s3049_s2 + $0x50] sm:$0xff] (!%p273_p2)  }
   0x8   : > { %s2434_s15 = smov (!%p273_p2), 17   ;;  %s2435_s16 = smov (!%p273_p2), 112  }
   0x9   : > { %s2436_s17 = smov (!%p273_p2), 15   ;;  %s2437_s18 = smov (!%p273_p2), 111   ;;  %v336_v10 = vadd.s32 (!%p273_p2), 128, %v335_v9  ;;  %v341_v11 = vand.u32 (!%p273_p2), 15, %v335_v9  ;;  %v428_v14 = vsub.s32 (!%p273_p2), 4, %v2563_v13  ;;  %v424_v15 = vsub.s32 (!%p273_p2), 0, %v2563_v13 }
   0xb   : > { %v348_v12 = vand.u32 (!%p273_p2), 15, %v336_v10  ;;  %vm361_vm0 = vcmp.ne.s32.totalorder (!%p273_p2), %v341_v11, 0  ;;  %vm363_vm7 = vcmp.ne.s32.totalorder (!%p273_p2), %v341_v11, 15  ;;  %v2384_v11 = vld [vmem:[%s3049_s2 + $0x58] sm:$0xff] (!%p273_p2)  }
   0xd   : > { %s3059_s28 = smov (!%p311_p3, %s2094_s28), 1  ;;  %vm362_vm1 = vcmp.ne.s32.totalorder %v348_v12, 0  ;;  %vm364_vm8 = vcmp.ne.s32.totalorder %v348_v12, 15 }
   0xe   : > { %s2351_s29 = smul.u32 40, %s3059_s28  ;;  %vm420_vm2 = vmpackc.low %vm362_vm1, %vm361_vm0  ;;  %vm1212_vm0 = vcmask 924672   ;;  %vm398_vm1 = vcmask 138240  }
   0xf   : > { %v421_v16 = vsel %vm420_vm2, 65537, %v2429_v0  ;;  %vm688_vm9 = vmpackc.low %vm364_vm8, %vm363_vm7  ;;  %vm1352_vm2 = vcmask 916480   ;;  %s2352_s22 = smul.u32 80, %s3059_s28 }
  0x10   : > { %s320_s10 = scalar_lea.vmem %s3048_s1, %s2351_s29  ;;  %v2568_v18 = vrot.slane %v421_v16, %v428_v14  ;;  %v2570_v19 = vrot.slane %v421_v16, %v424_v15  ;;  %v689_v41 = vsel %vm688_vm9, 65537, %v2429_v0  ;;  %v2385_v16 = vld [vmem:[%s3049_s2 + $0x1c] sm:$0xff]  }
  0x11   : > { %v2503_v1 = vld [vmem:[%s320_s10 + $0x10] ss:$8 sps:$4 sm:$0xff]   ;;  %v2505_v2 = vld [vmem:[%s320_s10] ss:$8 sps:$4 sm:$0xff]   ;;  %v2508_v3 = vld [vmem:[%s320_s10 + $0x14] ss:$8 sps:$4 sm:$0xff]   ;;  %v2621_v44 = vrot.slane %v689_v41, %v428_v14  ;;  %v2637_v51 = vrot.slane %v689_v41, %v424_v15  ;;  %s3004_s24 = scalar_lea.vmem %s3055_s8, %s2352_s22 }
  0x12   : > { %815 = vrot.lane.b32.xlu1 %v2503_v1, %s2430_s11  ;;  %v2510_v4 = vld [vmem:[%s320_s10 + $0x4] ss:$8 sps:$4 sm:$0xff]   ;;  %811 = vrot.lane.b32.xlu0 %v2505_v2, %s2430_s11  ;;  %vm431_vm4 = vcmp.ne.s16.totalorder %v2568_v18, 0  ;;  %vm430_vm5 = vcmp.ne.s16.totalorder %v2570_v19, 0 }
  0x13   : > { %v333_v5 = vld [vmem:[%s320_s10 + $0x20] sm:$0x33]  ;;  %vm699_vm14 = vcmp.ne.s16.totalorder %v2621_v44, 0  ;;  %vm698_vm15 = vcmp.ne.s16.totalorder %v2637_v51, 0 }
  0x14   : > { %v2514_v6 = vcombine.high %v333_v5, %v333_v5  ;;  %v2517_v7 = vcombine.low %v333_v5, %v333_v5  ;;  %v2383_v5 = vld [vmem:[%s3049_s2 + $0x14] sm:$0xff]   ;;  %v2398_v18 = vld [vmem:[%s3049_s2 + $0x88] ss:$0 sps:$4 sm:$0x33]   ;;  %v2404_v51 = vld [vmem:[%s3049_s2 + $0xa0] sm:$0xff]  }
  0x15   : > { %v2403_v44 = vld [vmem:[%s3049_s2 + $0x9c] ss:$0 sps:$4 sm:$0x33]  }
  0x16   : > { %817 = vrot.lane.b32.xlu1 %v2508_v3, %s2430_s11  ;;  %813 = vrot.lane.b32.xlu0 %v2510_v4, %s2430_s11  ;;  %v984_v49 = vsel %vm499_vm6, %v2517_v7, 0 }
  0x1a   : > { %821 = vrot.lane.b32.xlu1 %v2514_v6, %s2430_s11  ;;  %819 = vrot.lane.b32.xlu0 %v2517_v7, %s2430_s11 }
  0x1e   : > { %1062 = vrot.lane.b32.xlu1 %v2510_v4, %s2431_s12  ;;  %1060 = vrot.lane.b32.xlu0 %v2505_v2, %s2431_s12 }
  0x22   : > { %1066 = vrot.lane.b32.xlu1 %v2508_v3, %s2431_s12  ;;  %1064 = vrot.lane.b32.xlu0 %v2503_v1, %s2431_s12 }
  0x26   : > { %1070 = vrot.lane.b32.xlu1 %v2514_v6, %s2431_s12  ;;  %1068 = vrot.lane.b32.xlu0 %v2517_v7, %s2431_s12 }
  0x2a   : > { %445 = vrot.lane.b32.xlu1 %v2510_v4, %s2432_s13  ;;  %443 = vrot.lane.b32.xlu0 %v2505_v2, %s2432_s13 }
  0x2e   : > { %449 = vrot.lane.b32.xlu1 %v2508_v3, %s2432_s13  ;;  %447 = vrot.lane.b32.xlu0 %v2503_v1, %s2432_s13 }
  0x32   : > { %453 = vrot.lane.b32.xlu1 %v2514_v6, %s2432_s13  ;;  %451 = vrot.lane.b32.xlu0 %v2517_v7, %s2432_s13 }
  0x36   : > { %1202 = vrot.lane.b32.xlu1 %v2510_v4, %s2433_s14  ;;  %1200 = vrot.lane.b32.xlu0 %v2505_v2, %s2433_s14 }
  0x3a   : > { %1206 = vrot.lane.b32.xlu1 %v2508_v3, %s2433_s14  ;;  %1204 = vrot.lane.b32.xlu0 %v2503_v1, %s2433_s14 }
  0x3e   : > { %1210 = vrot.lane.b32.xlu1 %v2514_v6, %s2433_s14  ;;  %1208 = vrot.lane.b32.xlu0 %v2517_v7, %s2433_s14 }
  0x42   : > { %388 = vrot.lane.b32.xlu1 %v2510_v4, %s2434_s15  ;;  %386 = vrot.lane.b32.xlu0 %v2505_v2, %s2434_s15 }
  0x46   : > { %392 = vrot.lane.b32.xlu1 %v2508_v3, %s2434_s15  ;;  %390 = vrot.lane.b32.xlu0 %v2503_v1, %s2434_s15 }
  0x4a   : > { %396 = vrot.lane.b32.xlu1 %v2514_v6, %s2434_s15  ;;  %394 = vrot.lane.b32.xlu0 %v2517_v7, %s2434_s15 }
  0x4e   : > { %1342 = vrot.lane.b32.xlu1 %v2510_v4, %s2435_s16  ;;  %1340 = vrot.lane.b32.xlu0 %v2505_v2, %s2435_s16 }
  0x52   : > { %1346 = vrot.lane.b32.xlu1 %v2508_v3, %s2435_s16  ;;  %1344 = vrot.lane.b32.xlu0 %v2503_v1, %s2435_s16 }
  0x56   : > { %1350 = vrot.lane.b32.xlu1 %v2514_v6, %s2435_s16  ;;  %1348 = vrot.lane.b32.xlu0 %v2517_v7, %s2435_s16 }
  0x5a   : > { %657 = vrot.lane.b32.xlu1 %v2510_v4, %s2436_s17  ;;  %655 = vrot.lane.b32.xlu0 %v2505_v2, %s2436_s17 }
  0x5e   : > { %661 = vrot.lane.b32.xlu1 %v2508_v3, %s2436_s17  ;;  %659 = vrot.lane.b32.xlu0 %v2503_v1, %s2436_s17 }
  0x62   : > { %665 = vrot.lane.b32.xlu1 %v2514_v6, %s2436_s17  ;;  %663 = vrot.lane.b32.xlu0 %v2517_v7, %s2436_s17 }
  0x66   : > { %1473 = vrot.lane.b32.xlu1 %v2510_v4, %s2437_s18  ;;  %1471 = vrot.lane.b32.xlu0 %v2505_v2, %s2437_s18 }
  0x6a   : > { %1477 = vrot.lane.b32.xlu1 %v2508_v3, %s2437_s18  ;;  %1475 = vrot.lane.b32.xlu0 %v2503_v1, %s2437_s18 }
  0x6e   : > { %1481 = vrot.lane.b32.xlu1 %v2514_v6, %s2437_s18  ;;  %1479 = vrot.lane.b32.xlu0 %v2517_v7, %s2437_s18  ;;  %s2900_s18 = scalar_lea.vmem %s3047_s0, %s2351_s29 }
  0x84   : > { %v816_v17 = vpop.permute.xlu1 %815  ;;  %v812_v20 = vpop.permute.xlu0 %811 }
  0x85   : > { %v832_v22 = vsel %vm823_vm3, 0, %v812_v20  ;;  %v835_v26 = vsel %vm823_vm3, 0, %v816_v17 }
  0x86   : > { %v2583_v25 = vsel %vm430_vm5, %v832_v22, 0  ;;  %v2601_v33 = vsel %vm430_vm5, %v835_v26, 0 }
  0x88   : > { %v818_v21 = vpop.permute.xlu1 %817  ;;  %v814_v23 = vpop.permute.xlu0 %813 }
  0x89   : > { %v2576_v24 = vsel %vm823_vm3, %v812_v20, %v814_v23  ;;  %v2587_v27 = vsel %vm823_vm3, %v816_v17, %v818_v21  ;;  %v2386_v21 = vld [vmem:[%s3049_s2 + $0x60] ss:$0 sps:$4 sm:$0x33]  }
  0x8a   : > { %2155 = vmatprep.subr.msk.bf16.mxu0 %vm431_vm4, %v2576_v24 }
  0x8b   : > { %881 = vmatpush1.bf16.msra.mxu0 %v2583_v25 }
  0x8c   : > { %v822_v28 = vpop.permute.xlu1 %821  ;;  %2156 = vmatprep.subr.msk.bf16.mxu0 %vm431_vm4, %v2587_v27  ;;  %v820_v29 = vpop.permute.xlu0 %819 }
  0x8d   : > { %v826_v30 = vsel %vm823_vm3, %v820_v29, %v822_v28  ;;  %v838_v31 = vsel %vm823_vm3, 0, %v820_v29  ;;  %vm667_vm3 = vcmask 121856  }
  0x8e   : > { %v2597_v32 = vsel %vm431_vm4, %v826_v30, 0  ;;  %v844_v34 = vsel %vm430_vm5, %v838_v31, 0  ;;  %v2387_v30 = vld [vmem:[%s3049_s2 + $0x24] ss:$0 sps:$4 sm:$0x33]  }
  0x8f   : > { %883 = vmatpush1.bf16.msra.mxu0 %v2601_v33  ;;  %v2609_v37 = vsel %vm499_vm6, %v844_v34, 0 }
  0x90   : > { %v1063_v35 = vpop.permute.xlu1 %1062  ;;  %v1061_v36 = vpop.permute.xlu0 %1060  ;;  %2157 = vmatprep.subr.msk.bf16.mxu0 %vm499_vm6, %v2597_v32 }
  0x91   : > { %v1081_v50 = vsel %vm1072_vm12, %v1063_v35, 0  ;;  %v1073_v55 = vsel %vm1072_vm12, %v1061_v36, %v1063_v35 }
  0x92   : > { %v1089_v59 = vsel %vm698_vm15, %v1073_v55, 0 }
  0x93   : > { %885 = vmatpush1.bf16.msra.mxu0 %v2609_v37 }
  0x94   : > { %v1067_v39 = vpop.permute.xlu1 %1066  ;;  %v1065_v40 = vpop.permute.xlu0 %1064  ;;  %989 = vmatprep.subr.bf16.mxu0 %v2510_v4 }
  0x95   : > { %v1084_v61 = vsel %vm1072_vm12, %v1067_v39, 0  ;;  %v1074_v62 = vsel %vm1072_vm12, %v1065_v40, %v1067_v39  ;;  %v2388_v40 = vld [vmem:[%s3049_s2 + $0x64] sm:$0xff]  }
  0x96   : > { %2158 = vmatmul.mubr.msk.bf16.vlgmr.msra.gmra.mrb[0].mxu0 %vm489_vm10, %v2380_v38  ;;  %v1091_v7 = vsel %vm698_vm15, %v1074_v62, 0 }
  0x97   : > { %990 = vmatpush1.bf16.msra.mxu0 %v2505_v2  ;;  %922 = vmatprep.mubr.bf16.mxu0 %v2429_v0 }
  0x98   : > { %v1071_v42 = vpop.permute.xlu1 %1070  ;;  %v1069_v43 = vpop.permute.xlu0 %1068  ;;  %991 = vmatprep.subr.bf16.mxu0 %v2508_v3 }
  0x99   : > { %v1087_v2 = vsel %vm1072_vm12, %v1071_v42, 0  ;;  %v1075_v3 = vsel %vm1072_vm12, %v1069_v43, %v1071_v42 }
  0x9a   : > { %v1094_v9 = vsel %vm699_vm14, %v1087_v2, 0  ;;  %v1093_v10 = vsel %vm698_vm15, %v1075_v3, 0  ;;  %v2391_v2 = vld [vmem:[%s3049_s2 + $0x8] sm:$0xff]  }
  0x9b   : > { %992 = vmatpush1.bf16.msra.mxu0 %v2503_v1  ;;  %v1124_v14 = vsel %vm499_vm6, %v1093_v10, 0 }
  0x9c   : > { %v446_v46 = vpop.permute.xlu1 %445  ;;  %v444_v47 = vpop.permute.xlu0 %443  ;;  %2169 = vmatprep.subr.msk.bf16.mxu0 %vm499_vm6, %v2514_v6 }
  0x9d   : > { %v456_v52 = vsel %vm455_vm11, %v444_v47, %v446_v46 }
  0x9e   : > { %2159 = vmatmul.mubr.msk.bf16.gmra.mrb[4].mxu0 %vm489_vm10, %v2381_v45  ;;  %505 = vmatprep.subr.bf16.mxu1 %v456_v52 }
  0x9f   : > { %2117 = vmatpush1.bf16.msk.msra.mxu1 %vm2628_vm13, %v444_v47  ;;  %994 = vmatpush1.bf16.msra.mxu0 %v984_v49 }
  0xa0   : > { %v450_v53 = vpop.permute.xlu1 %449  ;;  %v448_v54 = vpop.permute.xlu0 %447  ;;  %1021 = vmatprep.mubr.bf16.mxu0 %v2429_v0  ;;  %2181 = vmatprep.subr.msk.bf16.mxu0 %vm699_vm14, %v1081_v50 }
  0xa1   : > { %v457_v56 = vsel %vm455_vm11, %v448_v54, %v450_v53 }
  0xa2   : > { %507 = vmatprep.subr.bf16.mxu1 %v457_v56  ;;  %v2389_v56 = vld [vmem:[%s3049_s2] sm:$0xff]  }
  0xa3   : > { %2119 = vmatpush1.bf16.msk.msra.mxu1 %vm2628_vm13, %v448_v54 }
  0xa4   : > { %v454_v58 = vpop.permute.xlu1 %453  ;;  %v452_v60 = vpop.permute.xlu0 %451 }
  0xa5   : > { %v458_v63 = vsel %vm455_vm11, %v452_v60, %v454_v58  ;;  %v469_v1 = vsel %vm455_vm11, 0, %v452_v60 }
  0xa6   : > { %2170 = vmatmul.mubr.msk.bf16.vlgmr.msra.gmra.mrb[0].mxu0 %vm489_vm10, %v2382_v57  ;;  %2120 = vmatprep.subr.msk.bf16.mxu1 %vm499_vm6, %v458_v63  ;;  %v500_v4 = vsel %vm499_vm6, %v469_v1, 0 }
  0xa7   : > { %1130 = vmatpush1.bf16.msra.mxu0 %v1089_v59  ;;  %510 = vmatpush1.bf16.msra.mxu1 %v500_v4  ;;  %v2392_v4 = vld [vmem:[%s3049_s2 + $0x74] ss:$0 sps:$4 sm:$0x33]  }
  0xa8   : > { %v1203_v6 = vpop.permute.xlu1 %1202  ;;  %v1201_v8 = vpop.permute.xlu0 %1200  ;;  %2182 = vmatprep.subr.msk.bf16.mxu0 %vm699_vm14, %v1084_v61  ;;  %1031 = vmatprep.mubr.bf16.mxu0 %v2429_v0  ;;  %v2390_v61 = vld [vmem:[%s3049_s2 + $0x6c] sm:$0xff]  }
  0xa9   : > { %v1221_v15 = vsel %vm1212_vm0, %v1203_v6, 0  ;;  %v1213_v35 = vsel %vm1212_vm0, %v1201_v8, %v1203_v6 }
  0xaa   : > { %2121 = vmatmul.mubr.msk.bf16.vlgmr.msra.gmra.mrb[0].mxu1 %vm489_vm10, %v2383_v5  ;;  %v1229_v42 = vsel %vm430_vm5, %v1213_v35, 0 }
  0xab   : > { %1132 = vmatpush1.bf16.msra.mxu0 %v1091_v7  ;;  %547 = vmatprep.mubr.bf16.mxu1 %v2429_v0 }
  0xac   : > { %v1207_v12 = vpop.permute.xlu1 %1206  ;;  %v1205_v13 = vpop.permute.xlu0 %1204  ;;  %2183 = vmatprep.subr.msk.bf16.mxu0 %vm499_vm6, %v1094_v9 }
  0xad   : > { %v1224_v45 = vsel %vm1212_vm0, %v1207_v12, 0  ;;  %v1214_v46 = vsel %vm1212_vm0, %v1205_v13, %v1207_v12 }
  0xae   : > { %2171 = vmatmul.mubr.msk.bf16.gmra.mrb[4].mxu0 %vm489_vm10, %v2384_v11  ;;  %v1231_v57 = vsel %vm430_vm5, %v1214_v46, 0  ;;  %v2393_v11 = vld [vmem:[%s3049_s2 + $0x10] ss:$0 sps:$4 sm:$0x33]  }
  0xaf   : > { %1134 = vmatpush1.bf16.msra.mxu0 %v1124_v14  ;;  %1041 = vmatprep.mubr.bf16.mxu0 %v2429_v0 }
  0xb0   : > { %v1211_v17 = vpop.permute.xlu1 %1210  ;;  %v1209_v20 = vpop.permute.xlu0 %1208  ;;  %2195 = vmatprep.subr.msk.bf16.mxu0 %vm431_vm4, %v1221_v15 }
  0xb1   : > { %v1227_v49 = vsel %vm1212_vm0, %v1211_v17, 0  ;;  %v1215_v50 = vsel %vm1212_vm0, %v1209_v20, %v1211_v17 }
  0xb2   : > { %2122 = vmatmul.mubr.msk.bf16.gmra.mrb[4].mxu1 %vm489_vm10, %v2385_v16  ;;  %v1234_v59 = vsel %vm431_vm4, %v1227_v49, 0  ;;  %v1233_v60 = vsel %vm430_vm5, %v1215_v50, 0  ;;  %v2394_v16 = vld [vmem:[%s3049_s2 + $0x78] sm:$0xff]  }
  0xb3   : > { %557 = vmatprep.mubr.bf16.mxu1 %v2429_v0  ;;  %v1264_v1 = vsel %vm499_vm6, %v1233_v60, 0  ;;  %v1781_v60 = vld [vmem:[%s3052_s5] sm:$0xff] }
  0xb4   : > { %v389_v22 = vpop.permute.xlu1 %388  ;;  %v387_v23 = vpop.permute.xlu0 %386  ;;  %1788 = vperm.xlu0 %2370, %v1781_v60  }
  0xb5   : > { %v399_v26 = vsel %vm398_vm1, %v387_v23, %v389_v22  ;;  %v408_v28 = vsel %vm398_vm1, 0, %v387_v23 }
  0xb6   : > { %v432_v29 = vsel %vm430_vm5, %v408_v28, 0  ;;  %2172 = vmatmul.mubr.msk.bf16.gmra.mrb[8].mxu0 %vm489_vm10, %v2386_v21  ;;  %2127 = vmatprep.subr.msk.bf16.mxu1 %vm431_vm4, %v399_v26 }
  0xb7   : > { %595 = vmatpush1.bf16.msra.mxu1 %v432_v29  ;;  %1161 = vmatprep.mubr.bf16.mxu0 %v2429_v0 }
  0xb8   : > { %v393_v31 = vpop.permute.xlu1 %392  ;;  %v391_v34 = vpop.permute.xlu0 %390 }
  0xb9   : > { %v400_v36 = vsel %vm398_vm1, %v391_v34, %v393_v31  ;;  %v411_v38 = vsel %vm398_vm1, 0, %v391_v34 }
  0xba   : > { %v434_v39 = vsel %vm430_vm5, %v411_v38, 0  ;;  %2123 = vmatmul.mubr.msk.bf16.gmra.mrb[8].mxu1 %vm489_vm10, %v2387_v30  ;;  %2128 = vmatprep.subr.msk.bf16.mxu1 %vm431_vm4, %v400_v36  ;;  %v2395_v30 = vld [vmem:[%s3049_s2 + $0x28] sm:$0xff]   ;;  %v2396_v36 = vld [vmem:[%s3049_s2 + $0x80] sm:$0xff]  }
  0xbb   : > { %597 = vmatpush1.bf16.msra.mxu1 %v434_v39  ;;  %626 = vmatprep.mubr.bf16.mxu1 %v2429_v0 }
  0xbc   : > { %v397_v41 = vpop.permute.xlu1 %396  ;;  %v395_v43 = vpop.permute.xlu0 %394 }
  0xbd   : > { %v401_v47 = vsel %vm398_vm1, %v395_v43, %v397_v41  ;;  %v414_v48 = vsel %vm398_vm1, 0, %v395_v43  ;;  %v2399_v41 = vld [vmem:[%s3049_s2 + $0x38] ss:$0 sps:$4 sm:$0x33]   ;;  %vm1859_vm1 = vcmask 1043456  }
  0xbe   : > { %v436_v52 = vsel %vm430_vm5, %v414_v48, 0  ;;  %v437_v53 = vsel %vm431_vm4, %v401_v47, 0  ;;  %2184 = vmatmul.mubr.msk.bf16.vlgmr.msra.gmra.mrb[0].mxu0 %vm489_vm10, %v2388_v40  ;;  %vm1483_vm5 = vcmask 908288   ;;  %v2397_v40 = vld [vmem:[%s3049_s2 + $0x30] sm:$0xff]  }
  0xbf   : > { %2129 = vmatprep.subr.msk.bf16.mxu1 %vm499_vm6, %v437_v53  ;;  %1270 = vmatpush1.bf16.msra.mxu0 %v1229_v42  ;;  %v589_v55 = vsel %vm499_vm6, %v436_v52, 0  ;;  %v2400_v42 = vld [vmem:[%s3049_s2 + $0x8c] sm:$0xff]   ;;  %v2401_v53 = vld [vmem:[%s3049_s2 + $0x94] sm:$0xff]  }
  0xc0   : > { %v1343_v54 = vpop.permute.xlu1 %1342  ;;  %599 = vmatpush1.bf16.msra.mxu1 %v589_v55  ;;  %v1341_v58 = vpop.permute.xlu0 %1340  ;;  %2196 = vmatprep.subr.msk.bf16.mxu0 %vm431_vm4, %v1224_v45  ;;  %v2402_v55 = vld [vmem:[%s3049_s2 + $0x4c] ss:$0 sps:$4 sm:$0x33]  }
  0xc1   : > { %1171 = vmatprep.mubr.bf16.mxu0 %v2429_v0  ;;  %v1353_v20 = vsel %vm1352_vm2, %v1341_v58, %v1343_v54  ;;  %v2406_v58 = vld [vmem:[%s3049_s2 + $0xb0] ss:$0 sps:$4 sm:$0x33]  }
  0xc3   : > { %2130 = vmatmul.mubr.msk.bf16.vlgmr.msra.gmra.mrb[0].mxu1 %vm489_vm10, %v2389_v56  ;;  %1272 = vmatpush1.bf16.msra.mxu0 %v1231_v57  ;;  %v2405_v57 = vld [vmem:[%s3049_s2 + $0xa8] sm:$0xff]  }
  0xc4   : > { %v1347_v62 = vpop.permute.xlu1 %1346  ;;  %v1345_v63 = vpop.permute.xlu0 %1344  ;;  %2197 = vmatprep.subr.msk.bf16.mxu0 %vm499_vm6, %v1234_v59  ;;  %636 = vmatprep.mubr.bf16.mxu1 %v2429_v0  ;;  %v1782_v59 = vld [vmem:[%s3052_s5 + $0x8] sm:$0xff] }
  0xc5   : > { %v1354_v31 = vsel %vm1352_vm2, %v1345_v63, %v1347_v62  ;;  %1793 = vperm.xlu1 %2371, %v1782_v59   ;;  %v1785_v63 = vld [vmem:[%s3052_s5 + $0x20] sm:$0xf] }
  0xc6   : > { %2185 = vmatmul.mubr.msk.bf16.gmra.mrb[4].mxu0 %vm489_vm10, %v2390_v61  ;;  %v1783_v61 = vld [vmem:[%s3052_s5 + $0x10] sm:$0xff] }
  0xc7   : > { %1274 = vmatpush1.bf16.msra.mxu0 %v1264_v1  ;;  %1181 = vmatprep.mubr.bf16.mxu0 %v2429_v0  ;;  %v1927_v1 = vld [vmem:[%s3053_s6] sm:$0xff] }
  0xc8   : > { %v1351_v19 = vpop.permute.xlu1 %1350  ;;  %v1349_v3 = vpop.permute.xlu0 %1348  ;;  %2209 = vmatprep.subr.msk.bf16.mxu0 %vm1352_vm2, %v1343_v54 }
  0xc9   : > { %v1366_v34 = vsel %vm1352_vm2, %v1351_v19, 0  ;;  %v1355_v35 = vsel %vm1352_vm2, %v1349_v3, %v1351_v19  ;;  %1798 = vperm.xlu1 %2371, %v1783_v61   ;;  %v1928_v19 = vld [vmem:[%s3053_s6 + $0x8] sm:$0xff]  ;;  %v1930_v3 = vld [vmem:[%s3053_s6 + $0x18] sm:$0xff] }
  0xca   : > { %v1396_v39 = vsel %vm499_vm6, %v1355_v35, 0 }
  0xcb   : > { %2131 = vmatmul.mubr.msk.bf16.gmra.mrb[4].mxu1 %vm489_vm10, %v2391_v2  ;;  %v1929_v2 = vld [vmem:[%s3053_s6 + $0x10] sm:$0xff] }
  0xcc   : > { %v658_v5 = vpop.permute.xlu1 %657  ;;  %v656_v6 = vpop.permute.xlu0 %655  ;;  %646 = vmatprep.mubr.bf16.mxu1 %v2429_v0 }
  0xcd   : > { %v668_v7 = vsel %vm667_vm3, %v656_v6, %v658_v5  ;;  %v676_v8 = vsel %vm667_vm3, 0, %v656_v6  ;;  %1808 = vperm.xlu1 %2371, %v1785_v63  }
  0xce   : > { %v700_v9 = vsel %vm698_vm15, %v676_v8, 0  ;;  %2186 = vmatmul.mubr.msk.bf16.gmra.mrb[8].mxu0 %vm489_vm10, %v2392_v4  ;;  %2141 = vmatprep.subr.msk.bf16.mxu1 %vm699_vm14, %v668_v7  ;;  %v1931_v4 = vld [vmem:[%s3053_s6 + $0x20] sm:$0xf] }
  0xcf   : > { %741 = vmatpush1.bf16.msra.mxu1 %v700_v9  ;;  %1301 = vmatprep.mubr.bf16.mxu0 %v2429_v0  ;;  %v1967_v8 = vld [vmem:[%s3054_s7] sm:$0xff] }
  0xd0   : > { %v662_v10 = vpop.permute.xlu1 %661  ;;  %v660_v12 = vpop.permute.xlu0 %659 }
  0xd1   : > { %v669_v13 = vsel %vm667_vm3, %v660_v12, %v662_v10  ;;  %v679_v14 = vsel %vm667_vm3, 0, %v660_v12  ;;  %1939 = vperm.xlu1 %2371, %v1928_v19   ;;  %v1968_v10 = vld [vmem:[%s3054_s7 + $0x8] sm:$0xff]  ;;  %v1970_v12 = vld [vmem:[%s3054_s7 + $0x18] sm:$0xff] }
  0xd2   : > { %v702_v15 = vsel %vm698_vm15, %v679_v14, 0  ;;  %2142 = vmatprep.subr.msk.bf16.mxu1 %vm699_vm14, %v669_v13 }
  0xd3   : > { %2132 = vmatmul.mubr.msk.bf16.gmra.mrb[8].mxu1 %vm489_vm10, %v2393_v11  ;;  %v1969_v11 = vld [vmem:[%s3054_s7 + $0x10] sm:$0xff] }
  0xd4   : > { %v666_v17 = vpop.permute.xlu1 %665  ;;  %743 = vmatpush1.bf16.msra.mxu1 %v702_v15  ;;  %v664_v21 = vpop.permute.xlu0 %663  ;;  %772 = vmatprep.mubr.bf16.mxu1 %v2429_v0 }
  0xd5   : > { %v670_v22 = vsel %vm667_vm3, %v664_v21, %v666_v17  ;;  %v682_v23 = vsel %vm667_vm3, 0, %v664_v21  ;;  %1949 = vperm.xlu1 %2371, %v1930_v3  }
  0xd6   : > { %v704_v26 = vsel %vm698_vm15, %v682_v23, 0  ;;  %v705_v28 = vsel %vm699_vm14, %v670_v22, 0  ;;  %2198 = vmatmul.mubr.msk.bf16.vlgmr.msra.gmra.mrb[0].mxu0 %vm489_vm10, %v2394_v16  ;;  %v1971_v16 = vld [vmem:[%s3054_s7 + $0x20] sm:$0xf] }
  0xd7   : > { %1401 = vmatpush1.bf16.msra.mxu0 %v1353_v20  ;;  %2143 = vmatprep.subr.msk.bf16.mxu1 %vm499_vm6, %v705_v28  ;;  %v735_v29 = vsel %vm499_vm6, %v704_v26, 0 }
  0xd8   : > { %745 = vmatpush1.bf16.msra.mxu1 %v735_v29  ;;  %2210 = vmatprep.subr.msk.bf16.mxu0 %vm1352_vm2, %v1347_v62  ;;  %v1474_v38 = vpop.permute.xlu1 %1473  ;;  %v1784_v62 = vld [vmem:[%s3052_s5 + $0x18] sm:$0xff] }
  0xd9   : > { %2251 = vmatprep.subr.msk.bf16.mxu1 %vm431_vm4, %v2576_v24  ;;  %1311 = vmatprep.mubr.bf16.mxu0 %v2429_v0  ;;  %v1492_v24 = vsel %vm1483_vm5, %v1474_v38, 0 }
  0xda   : > { %1803 = vperm.xlu0 %2370, %v1784_v62   ;;  %1974 = vperm.xlu1 %2371, %v1967_v8  }
  0xdb   : > { %1403 = vmatpush1.bf16.msra.mxu0 %v1354_v31  ;;  %2144 = vmatmul.mubr.msk.bf16.vlgmr.msra.gmra.mrb[0].mxu1 %vm489_vm10, %v2395_v30 }
  0xdc   : > { %2254 = vmatpush1.bf16.msra.mxu1 %v2583_v25  ;;  %2211 = vmatprep.subr.msk.bf16.mxu0 %vm499_vm6, %v1366_v34  ;;  %v1472_v25 = vpop.permute.xlu0 %1471 }
  0xdd   : > { %2252 = vmatprep.subr.msk.bf16.mxu1 %vm431_vm4, %v2587_v27  ;;  %782 = vmatprep.mubr.bf16.mxu1 %v2429_v0  ;;  %v1478_v27 = vpop.permute.xlu1 %1477 }
  0xde   : > { %2199 = vmatmul.mubr.msk.bf16.gmra.mrb[4].mxu0 %vm489_vm10, %v2396_v36  ;;  %v1495_v46 = vsel %vm1483_vm5, %v1478_v27, 0  ;;  %1934 = vperm.xlu0 %2370, %v1927_v1  }
  0xdf   : > { %1405 = vmatpush1.bf16.msra.mxu0 %v1396_v39  ;;  %1321 = vmatprep.mubr.bf16.mxu0 %v2429_v0 }
  0xe0   : > { %2255 = vmatpush1.bf16.msra.mxu1 %v2601_v33  ;;  %2223 = vmatprep.subr.msk.bf16.mxu0 %vm699_vm14, %v1492_v24  ;;  %v1476_v33 = vpop.permute.xlu0 %1475 }
  0xe1   : > { %2253 = vmatprep.subr.msk.bf16.mxu1 %vm499_vm6, %v2597_v32  ;;  %v1484_v32 = vsel %vm1483_vm5, %v1472_v25, %v1474_v38  ;;  %v1485_v47 = vsel %vm1483_vm5, %v1476_v33, %v1478_v27  ;;  %1984 = vperm.xlu1 %2371, %v1969_v11   ;;  %v2414_v11 = vld [vmem:[%s2900_s18 + $0x14] ss:$8 sps:$4 sm:$0xff]  }
  0xe2   : > { %v1500_v43 = vsel %vm698_vm15, %v1484_v32, 0  ;;  %v1502_v50 = vsel %vm698_vm15, %v1485_v47, 0  ;;  %1944 = vperm.xlu0 %2370, %v1929_v2  }
  0xe3   : > { %2145 = vmatmul.mubr.msk.bf16.gmra.mrb[4].mxu1 %vm489_vm10, %v2397_v40 }
  0xe4   : > { %2256 = vmatpush1.bf16.msra.mxu1 %v2609_v37  ;;  %792 = vmatprep.mubr.bf16.mxu1 %v2429_v0  ;;  %v1482_v37 = vpop.permute.xlu1 %1481  ;;  %v1480_v45 = vpop.permute.xlu0 %1479 }
  0xe5   : > { %v1498_v48 = vsel %vm1483_vm5, %v1482_v37, 0  ;;  %v1486_v49 = vsel %vm1483_vm5, %v1480_v45, %v1482_v37  ;;  %1994 = vperm.xlu1 %2371, %v1971_v16   ;;  %v2411_v16 = vld [vmem:[%s3050_s3 + $0x8] sm:$0xff]  }
  0xe6   : > { %2200 = vmatmul.mubr.msk.bf16.gmra.mrb[8].mxu0 %vm489_vm10, %v2398_v18  ;;  %v1505_v52 = vsel %vm699_vm14, %v1498_v48, 0  ;;  %v1504_v54 = vsel %vm698_vm15, %v1486_v49, 0  ;;  %1954 = vperm.xlu0 %2370, %v1931_v4  }
  0xe7   : > { %1432 = vmatprep.mubr.bf16.mxu0 %v2429_v0  ;;  %v1535_v56 = vsel %vm499_vm6, %v1504_v54, 0 }
  0xea   : > { %1979 = vperm.xlu0 %2370, %v1968_v10   ;;  %v2408_v10 = vld [vmem:[%s2900_s18] ss:$8 sps:$4 sm:$0xff]  }
  0xeb   : > { %2146 = vmatmul.mubr.msk.bf16.gmra.mrb[8].mxu1 %vm489_vm10, %v2399_v41 }
  0xec   : > { %932 = vmatprep.mubr.bf16.mxu1 %v2429_v0 }
  0xee   : > { %2212 = vmatmul.mubr.msk.bf16.vlgmr.msra.gmra.mrb[0].mxu0 %vm489_vm10, %v2400_v42  ;;  %1989 = vperm.xlu0 %2370, %v1970_v12   ;;  %v1780_v12 = vld [vmem:[%s2900_s18 + $0x20] sm:$0xff] }
  0xef   : > { %1541 = vmatpush1.bf16.msra.mxu0 %v1500_v43  ;;  %1442 = vmatprep.mubr.bf16.mxu0 %v2429_v0 }
  0xf0   : > { %2224 = vmatprep.subr.msk.bf16.mxu0 %vm699_vm14, %v1495_v46 }
  0xf3   : > { %1543 = vmatpush1.bf16.msra.mxu0 %v1502_v50 }
  0xf4   : > { %2225 = vmatprep.subr.msk.bf16.mxu0 %vm499_vm6, %v1505_v52 }
  0xf6   : > { %2213 = vmatmul.mubr.msk.bf16.gmra.mrb[4].mxu0 %vm489_vm10, %v2401_v53 }
  0xf7   : > { %2160 = vmatmul.mubr.msk.bf16.vlgmr.msra.gmra.mrb[8].mxu1 %vm489_vm10, %v2402_v55  ;;  %1452 = vmatprep.mubr.bf16.mxu0 %v2429_v0 }
  0xf8   : > { %1545 = vmatpush1.bf16.msra.mxu0 %v1535_v56  ;;  %1712 = vmatprep.mubr.bf16.mxu1 %v2429_v0 }
  0xfe   : > { %2214 = vmatmul.mubr.msk.bf16.gmra.mrb[8].mxu0 %vm489_vm10, %v2403_v44 }
  0xff   : > { %1572 = vmatprep.mubr.bf16.mxu0 %v2429_v0 }
 0x106   : > { %2226 = vmatmul.mubr.msk.bf16.vlgmr.msra.gmra.mrb[0].mxu0 %vm489_vm10, %v2404_v51 }
 0x107   : > { %1582 = vmatprep.mubr.bf16.mxu0 %v2429_v0 }
 0x10e   : > { %2227 = vmatmul.mubr.msk.bf16.gmra.mrb[4].mxu0 %vm489_vm10, %v2405_v57 }
 0x10f   : > { %1592 = vmatprep.mubr.bf16.mxu0 %v2429_v0 }
 0x116   : > { %2228 = vmatmul.mubr.msk.bf16.gmra.mrb[8].mxu0 %vm489_vm10, %v2406_v58 }
 0x1ae   : > { %v774_v5 = vpop.f32.mrb[0].mxu1 }
 0x1af   : > { %v776_v6 = vpop.f32.mrb[1].mxu1 }
 0x1b0   : > { %v778_v7 = vpop.f32.mrb[2].mxu1 }
 0x1b1   : > { %v780_v9 = vpop.f32.mrb[3].mxu1 }
 0x1b6   : > { %v784_v13 = vpop.f32.mrb[4].mxu1 }
 0x1b7   : > { %v786_v14 = vpop.f32.mrb[5].mxu1 }
 0x1b8   : > { %v788_v15 = vpop.f32.mrb[6].mxu1 }
 0x1b9   : > { %v790_v17 = vpop.f32.mrb[7].mxu1 }
 0x1ca   : > { %v934_v20 = vpop.f32.mrb[8].mxu1 }
 0x1cb   : > { %v936_v21 = vpop.f32.mrb[9].mxu1 }
 0x1cc   : > { %v938_v22 = vpop.f32.mrb[10].mxu1 }
 0x1cd   : > { %v939_v23 = vpop.f32.mrb[11].mxu1  ;;  %v2419_v22 = vld [vmem:[%s3051_s4 + $0x8] sm:$0xff]  }
 0x1ce   : > { %v2420_v23 = vld [vmem:[%s3051_s4 + $0x10] ss:$0 sps:$4 sm:$0x33]  }
 0x1d9   : > { %v1574_v26 = vpop.f32.mrb[0].mxu0 }
 0x1da   : > { %v2257_v28 = vadd.f32 %v1574_v26, %v774_v5  ;;  %v1576_v29 = vpop.f32.mrb[1].mxu0  ;;  %v1794_v26 = vpop.permute.xlu1 %1793 }
 0x1db   : > { %v2258_v30 = vadd.f32 %v1576_v29, %v776_v6  ;;  %v1578_v31 = vpop.f32.mrb[2].mxu0 }
 0x1dc   : > { %v1621_v34 = vmul.f32 0.2, %v2257_v28  ;;  %v2259_v35 = vadd.f32 %v1578_v31, %v778_v7  ;;  %v1580_v36 = vpop.f32.mrb[3].mxu0  ;;  %vm1611_vm4 = vcmp.ge.f32.partialorder %v2257_v28, 0.0  ;;  %v2410_v7 = vld [vmem:[%s2900_s18 + $0x4] ss:$8 sps:$4 sm:$0xff]  }
 0x1dd   : > { %v1622_v38 = vmul.f32 0.2, %v2258_v30  ;;  %v2260_v39 = vadd.f32 %v1580_v36, %v780_v9  ;;  %vm1612_vm7 = vcmp.ge.f32.partialorder %v2258_v30, 0.0  ;;  %v2407_v9 = vld [vmem:[%s3050_s3] sm:$0xff]  }
 0x1de   : > { %vm1613_vm8 = vcmp.ge.f32.partialorder %v2259_v35, 0.0  ;;  %v1623_v24 = vmul.f32 0.2, %v2259_v35  ;;  %v1631_v25 = vsel %vm1611_vm4, %v2257_v28, %v1621_v34  ;;  %v1789_v28 = vpop.permute.xlu0 %1788 }
 0x1df   : > { %vm1614_vm9 = vcmp.ge.f32.partialorder %v2260_v39, 0.0  ;;  %v1624_v40 = vmul.f32 0.2, %v2260_v39  ;;  %v1632_v41 = vsel %vm1612_vm7, %v2258_v30, %v1622_v38 }
 0x1e0   : > { %v1633_v18 = vsel %vm1613_vm8, %v2259_v35, %v1623_v24  ;;  %v1799_v35 = vpop.permute.xlu1 %1798 }
 0x1e1   : > { %v1646_v27 = vpack.c.bf16 %v1633_v18, %v1631_v25  ;;  %v1584_v33 = vpop.f32.mrb[4].mxu0  ;;  %v1634_v32 = vsel %vm1614_vm9, %v2260_v39, %v1624_v40 }
 0x1e2   : > { %v2261_v42 = vadd.f32 %v1584_v33, %v784_v13  ;;  %v1586_v37 = vpop.f32.mrb[5].mxu0  ;;  %v1647_v43 = vpack.c.bf16 %v1634_v32, %v1632_v41  ;;  %v2412_v13 = vld [vmem:[%s2900_s18 + $0x10] ss:$8 sps:$4 sm:$0xff]   ;;  %v2980_v36 = vpop.permute.xlu0 %1803 }
 0x1e3   : > { %v2262_v45 = vadd.f32 %v1586_v37, %v786_v14  ;;  %v1588_v46 = vpop.f32.mrb[6].mxu0  ;;  %v2244_v14 = vcombine.high %v1780_v12, %v1780_v12 }
 0x1e4   : > { %v1625_v47 = vmul.f32 0.2, %v2261_v42  ;;  %v2263_v48 = vadd.f32 %v1588_v46, %v788_v15  ;;  %v1590_v49 = vpop.f32.mrb[7].mxu0  ;;  %1680 = vmatprep.subr.bf16.mxu1 %v1647_v43  ;;  %vm1615_vm11 = vcmp.ge.f32.partialorder %v2261_v42, 0.0  ;;  %v2243_v15 = vcombine.low %v1780_v12, %v1780_v12  ;;  %v2986_v24 = vpop.permute.xlu1 %1808 }
 0x1e5   : > { %v1626_v50 = vmul.f32 0.2, %v2262_v45  ;;  %v2264_v52 = vadd.f32 %v1590_v49, %v790_v17  ;;  %1681 = vmatpush1.bf16.msra.mxu1 %v1646_v27  ;;  %vm1616_vm12 = vcmp.ge.f32.partialorder %v2262_v45, 0.0 }
 0x1e6   : > { %vm1617_vm13 = vcmp.ge.f32.partialorder %v2263_v48, 0.0  ;;  %v1627_v53 = vmul.f32 0.2, %v2263_v48  ;;  %v1635_v55 = vsel %vm1615_vm11, %v2261_v42, %v1625_v47  ;;  %v1861_v17 = vsel %vm1859_vm1, %v2243_v15, 0  ;;  %v1935_v25 = vpop.permute.xlu0 %1934 }
 0x1e7   : > { %vm1618_vm14 = vcmp.ge.f32.partialorder %v2264_v52, 0.0  ;;  %v1628_v54 = vmul.f32 0.2, %v2264_v52  ;;  %v1636_v57 = vsel %vm1616_vm12, %v2262_v45, %v1626_v50 }
 0x1e8   : > { %v1637_v56 = vsel %vm1617_vm13, %v2263_v48, %v1627_v53  ;;  %v1940_v18 = vpop.permute.xlu1 %1939 }
 0x1e9   : > { %v1648_v44 = vpack.c.bf16 %v1637_v56, %v1635_v55  ;;  %v1594_v51 = vpop.f32.mrb[8].mxu0  ;;  %v1638_v58 = vsel %vm1618_vm14, %v2264_v52, %v1628_v54 }
 0x1ea   : > { %v2265_v59 = vadd.f32 %v1594_v51, %v934_v20  ;;  %v1596_v60 = vpop.f32.mrb[9].mxu0  ;;  %v1649_v61 = vpack.c.bf16 %v1638_v58, %v1636_v57  ;;  %v2415_v20 = vld [vmem:[%s3050_s3 + $0x10] ss:$0 sps:$4 sm:$0x33]   ;;  %v1945_v41 = vpop.permute.xlu0 %1944 }
 0x1eb   : > { %v2266_v62 = vadd.f32 %v1596_v60, %v936_v21  ;;  %v1598_v63 = vpop.f32.mrb[10].mxu0  ;;  %v2418_v21 = vld [vmem:[%s3051_s4] sm:$0xff]  }
 0x1ec   : > { %vm1619_vm15 = vcmp.ge.f32.partialorder %v2265_v59, 0.0  ;;  %v1629_v1 = vmul.f32 0.2, %v2265_v59  ;;  %v1599_v19 = vpop.f32.mrb[11].mxu0  ;;  %1682 = vmatprep.subr.bf16.mxu1 %v1649_v61  ;;  %v2996_v37 = vpop.permute.xlu1 %1949 }
 0x1ed   : > { %vm1620_vm0 = vcmp.ge.f32.partialorder %v2266_v62, 0.0  ;;  %v1630_v2 = vmul.f32 0.2, %v2266_v62  ;;  %1683 = vmatpush1.bf16.msra.mxu1 %v1648_v44 }
 0x1ee   : > { %v1639_v3 = vsel %vm1619_vm15, %v2265_v59, %v1629_v1  ;;  %v2998_v43 = vpop.permute.xlu0 %1954 }
 0x1ef   : > { %v1650_v4 = vpack.c.bf16 %v1639_v3, %v1639_v3  ;;  %v1640_v5 = vsel %vm1620_vm0, %v2266_v62, %v1630_v2 }
 0x1f0   : > { %v1651_v6 = vpack.c.bf16 %v1640_v5, %v1640_v5  ;;  %v1975_v44 = vpop.permute.xlu1 %1974 }
 0x1f1   : > { %v1675_v8 = vsel %vm499_vm6, %v1650_v4, 0 }
 0x1f2   : > { %2232 = vmatprep.subr.msk.bf16.mxu1 %vm499_vm6, %v1651_v6  ;;  %vm1849_vm6 = vcmask 326656   ;;  %v1980_v62 = vpop.permute.xlu0 %1979 }
 0x1f3   : > { %1685 = vmatpush1.bf16.msra.mxu1 %v1675_v8 }
 0x1f4   : > { %1866 = vmatprep.subr.bf16.mxu1 %v2410_v7 }
 0x1f6   : > { %2233 = vmatmul.mubr.msk.bf16.vlgmr.msra.gmra.mrb[12].mxu1 %vm489_vm10, %v2407_v9 }
 0x1f7   : > { %1867 = vmatpush1.bf16.msra.mxu1 %v2408_v10  ;;  %1722 = vmatprep.mubr.bf16.mxu1 %v2429_v0 }
 0x1f8   : > { %1868 = vmatprep.subr.bf16.mxu1 %v2414_v11 }
 0x1fb   : > { %1869 = vmatpush1.bf16.msra.mxu1 %v2412_v13 }
 0x1fc   : > { %2245 = vmatprep.subr.msk.bf16.mxu1 %vm1859_vm1, %v2244_v14 }
 0x1fe   : > { %2234 = vmatmul.mubr.msk.bf16.gmra.mrb[16].mxu1 %vm489_vm10, %v2411_v16 }
 0x1ff   : > { %1732 = vmatprep.mubr.bf16.mxu1 %v2429_v0  ;;  %1871 = vmatpush1.bf16.msra.mxu1 %v1861_v17 }
 0x206   : > { %2235 = vmatmul.mubr.msk.bf16.gmra.mrb[20].mxu1 %vm489_vm10, %v2415_v20 }
 0x207   : > { %1898 = vmatprep.mubr.bf16.mxu1 %v2429_v0 }
 0x20e   : > { %2246 = vmatmul.mubr.msk.bf16.vlgmr.msra.gmra.mrb[24].mxu1 %vm1849_vm6, %v2418_v21 }
 0x20f   : > { %1908 = vmatprep.mubr.bf16.mxu1 %v2429_v0 }
 0x216   : > { %2247 = vmatmul.mubr.msk.bf16.gmra.mrb[28].mxu1 %vm1849_vm6, %v2419_v22 }
 0x217   : > { %1918 = vmatprep.mubr.bf16.mxu1 %v2429_v0 }
 0x21e   : > { %2248 = vmatmul.mubr.msk.bf16.gmra.mrb[32].mxu1 %vm1849_vm6, %v2420_v23  ;;  %v1985_v23 = vpop.permute.xlu1 %1984 }
 0x2c9   : > { %v1714_v29 = vpop.f32.mrb[12].mxu1 }
 0x2ca   : > { %v1716_v30 = vpop.f32.mrb[13].mxu1  ;;  %v1751_v48 = vmul.f32 0.2, %v1714_v29  ;;  %vm1741_vm10 = vcmp.ge.f32.partialorder %v1714_v29, 0.0 }
 0x2cb   : > { %v1718_v31 = vpop.f32.mrb[14].mxu1  ;;  %v1752_v52 = vmul.f32 0.2, %v1716_v30  ;;  %vm1742_vm2 = vcmp.ge.f32.partialorder %v1716_v30, 0.0 }
 0x2cc   : > { %v1720_v34 = vpop.f32.mrb[15].mxu1  ;;  %v1753_v56 = vmul.f32 0.2, %v1718_v31  ;;  %vm1743_vm3 = vcmp.ge.f32.partialorder %v1718_v31, 0.0  ;;  %v1761_v61 = vsel %vm1741_vm10, %v1714_v29, %v1751_v48 }
 0x2cd   : > { %v1754_v58 = vmul.f32 0.2, %v1720_v34  ;;  %vm1744_vm5 = vcmp.ge.f32.partialorder %v1720_v34, 0.0  ;;  %v1762_v19 = vsel %vm1742_vm2, %v1716_v30, %v1752_v52 }
 0x2ce   : > { %v1763_v4 = vsel %vm1743_vm3, %v1718_v31, %v1753_v56 }
 0x2cf   : > { %v1764_v8 = vsel %vm1744_vm5, %v1720_v34, %v1754_v58 }
 0x2d1   : > { %v2982_v38 = vpop.f32.mrb[16].mxu1 }
 0x2d2   : > { %v2984_v39 = vpop.f32.mrb[17].mxu1  ;;  %v1755_v12 = vmul.f32 0.2, %v2982_v38  ;;  %vm1745_vm4 = vcmp.ge.f32.partialorder %v2982_v38, 0.0 }
 0x2d3   : > { %v2988_v0 = vpop.f32.mrb[18].mxu1  ;;  %v1756_v16 = vmul.f32 0.2, %v2984_v39  ;;  %vm1746_vm7 = vcmp.ge.f32.partialorder %v2984_v39, 0.0 }
 0x2d4   : > { %v2990_v40 = vpop.f32.mrb[19].mxu1  ;;  %v1757_v22 = vmul.f32 0.2, %v2988_v0  ;;  %vm1747_vm8 = vcmp.ge.f32.partialorder %v2988_v0, 0.0  ;;  %v1765_v34 = vsel %vm1745_vm4, %v2982_v38, %v1755_v12 }
 0x2d5   : > { %v1758_v29 = vmul.f32 0.2, %v2990_v40  ;;  %vm1748_vm9 = vcmp.ge.f32.partialorder %v2990_v40, 0.0 }
 0x2d7   : > { %v1768_v48 = vsel %vm1748_vm9, %v2990_v40, %v1758_v29 }
 0x2d9   : > { %v2992_v27 = vpop.f32.mrb[20].mxu1 }
 0x2da   : > { %v2994_v33 = vpop.f32.mrb[21].mxu1  ;;  %vm1749_vm11 = vcmp.ge.f32.partialorder %v2992_v27, 0.0 }
 0x2db   : > { %v1738_v32 = vpop.f32.mrb[22].mxu1  ;;  %vm1750_vm12 = vcmp.ge.f32.partialorder %v2994_v33, 0.0 }
 0x2dc   : > { %v1739_v42 = vpop.f32.mrb[23].mxu1 }
 0x2dd   : > { %v1767_v42 = vsel %vm1747_vm8, %v2988_v0, %v1757_v22  ;;  %v1760_v0 = vmul.f32 0.2, %v2994_v33 }
 0x2e1   : > { %v1900_v45 = vpop.f32.mrb[24].mxu1 }
 0x2e2   : > { %v1901_v46 = vadd.f32 %v1900_v45, %v1789_v28  ;;  %v1902_v47 = vpop.f32.mrb[25].mxu1 }
 0x2e3   : > { %v1903_v49 = vadd.f32 %v1902_v47, %v1789_v28  ;;  %v1904_v50 = vpop.f32.mrb[26].mxu1 }
 0x2e4   : > { %v1957_v53 = vmul.f32 %v1935_v25, %v1901_v46  ;;  %v1905_v54 = vadd.f32 %v1904_v50, %v1794_v26  ;;  %v1906_v55 = vpop.f32.mrb[27].mxu1 }
 0x2e5   : > { %v1958_v51 = vmul.f32 %v1935_v25, %v1903_v49  ;;  %v1907_v57 = vadd.f32 %v1906_v55, %v1794_v26  ;;  %v1995_v55 = vpop.permute.xlu1 %1994 }
 0x2e6   : > { %v1997_v59 = vadd.f32 %v1975_v44, %v1957_v53  ;;  %v1959_v60 = vmul.f32 %v1940_v18, %v1905_v54 }
 0x2e7   : > { %v1998_v63 = vadd.f32 %v1975_v44, %v1958_v51  ;;  %v1960_v1 = vmul.f32 %v1940_v18, %v1907_v57  ;;  %v1770_v57 = vsel %vm1750_vm12, %v2994_v33, %v1760_v0 }
 0x2e8   : > { %v2007_v2 = vadd.f32 %v1997_v59, %v1761_v61  ;;  %v1999_v3 = vadd.f32 %v1980_v62, %v1959_v60 }
 0x2e9   : > { %v2008_v5 = vadd.f32 %v1998_v63, %v1762_v19  ;;  %v2000_v6 = vadd.f32 %v1980_v62, %v1960_v1  ;;  %v1910_v7 = vpop.f32.mrb[28].mxu1 }
 0x2ea   : > { %2017 = vst [vmem:[%s3004_s24] sm:$0xff] %v2007_v2  ;;  %v2009_v9 = vadd.f32 %v1999_v3, %v1763_v4  ;;  %v1911_v10 = vadd.f32 %v1910_v7, %v1799_v35  ;;  %v1912_v11 = vpop.f32.mrb[29].mxu1 }
 0x2eb   : > { %2018 = vst [vmem:[%s3004_s24 + $0x8] sm:$0xff] %v2008_v5  ;;  %v2010_v13 = vadd.f32 %v2000_v6, %v1764_v8  ;;  %v1913_v14 = vadd.f32 %v1912_v11, %v1799_v35  ;;  %v1914_v15 = vpop.f32.mrb[30].mxu1  ;;  %v1990_v35 = vpop.permute.xlu0 %1989 }
 0x2ec   : > { %2019 = vst [vmem:[%s3004_s24 + $0x10] sm:$0xff] %v2009_v9  ;;  %v1961_v17 = vmul.f32 %v1945_v41, %v1911_v10  ;;  %v1915_v20 = vadd.f32 %v1914_v15, %v2980_v36  ;;  %v1916_v21 = vpop.f32.mrb[31].mxu1 }
 0x2ed   : > { %2020 = vst [vmem:[%s3004_s24 + $0x18] sm:$0xff] %v2010_v13  ;;  %v1962_v26 = vmul.f32 %v1945_v41, %v1913_v14  ;;  %v1917_v28 = vadd.f32 %v1916_v21, %v2980_v36  ;;  %v1766_v36 = vsel %vm1746_vm7, %v2984_v39, %v1756_v16 }
 0x2ee   : > { %v2001_v30 = vadd.f32 %v1985_v23, %v1961_v17  ;;  %v1963_v31 = vmul.f32 %v2996_v37, %v1915_v20 }
 0x2ef   : > { %v2002_v25 = vadd.f32 %v1985_v23, %v1962_v26  ;;  %v1964_v18 = vmul.f32 %v2996_v37, %v1917_v28  ;;  %v1759_v37 = vmul.f32 0.2, %v2992_v27 }
 0x2f0   : > { %v2011_v41 = vadd.f32 %v2001_v30, %v1765_v34  ;;  %v2003_v32 = vadd.f32 %v1990_v35, %v1963_v31 }
 0x2f1   : > { %v2012_v45 = vadd.f32 %v2002_v25, %v1766_v36  ;;  %v2004_v46 = vadd.f32 %v1990_v35, %v1964_v18  ;;  %v1920_v47 = vpop.f32.mrb[32].mxu1 }
 0x2f2   : > { %2021 = vst [vmem:[%s3004_s24 + $0x20] sm:$0xff] %v2011_v41  ;;  %v2013_v38 = vadd.f32 %v2003_v32, %v1767_v42  ;;  %v1921_v49 = vadd.f32 %v1920_v47, %v2986_v24  ;;  %v1922_v50 = vpop.f32.mrb[33].mxu1 }
 0x2f3   : > { %2022 = vst [vmem:[%s3004_s24 + $0x28] sm:$0xff] %v2012_v45  ;;  %v2014_v39 = vadd.f32 %v2004_v46, %v1768_v48  ;;  %v1923_v52 = vadd.f32 %v1922_v50, %v2986_v24  ;;  %v1924_v53 = vpop.f32.mrb[34].mxu1  ;;  %v1769_v24 = vsel %vm1749_vm11, %v2992_v27, %v1759_v37 }
 0x2f4   : > { %2023 = vst [vmem:[%s3004_s24 + $0x30] sm:$0xff] %v2013_v38  ;;  %v1965_v40 = vmul.f32 %v2998_v43, %v1921_v49  ;;  %v1925_v54 = vpop.f32.mrb[35].mxu1 }
 0x2f5   : > { %2024 = vst [vmem:[%s3004_s24 + $0x38] sm:$0xff] %v2014_v39  ;;  %v1966_v56 = vmul.f32 %v2998_v43, %v1923_v52 }
 0x2f6   : > { %v2005_v44 = vadd.f32 %v1995_v55, %v1965_v40 }
 0x2f7   : > { %v2006_v51 = vadd.f32 %v1995_v55, %v1966_v56 }
 0x2f8   : > { %v2015_v58 = vadd.f32 %v2005_v44, %v1769_v24 }
 0x2f9   : > { %v2016_v59 = vadd.f32 %v2006_v51, %v1770_v57 }
 0x2fa   : > { %2025 = vst [vmem:[%s3004_s24 + $0x40] sm:$0xf] %v2015_v58 }
 0x2fb   : > { %2026 = vst [vmem:[%s3004_s24 + $0x48] sm:$0xf] %v2016_v59 }
 0x2fc PF: > { %s18_s27 = sadd.s32 1, %s2427_s27  }
 0x2fd   : > { %p15_p4 = scmp.ge.s32.totalorder %s18_s27, 4  }
 0x2ff   :  { %17 = sbr.rel (!%p15_p4) target bundleno = 1 (0x1), region = 93 }

</bundles_post_ra>
